<compile_context>
chip_gen: v7x
topology: tpu7x:2x2x1
jax: 0.10.0
libtpu: 0.0.40
codegen_flags: <defaults>
</compile_context>

<pallas_src>
import functools

import jax
import jax.numpy as jnp
from jax.experimental import pallas as pl
from jax.experimental.pallas import tpu as pltpu


def _round_up(n, m):
    return ((n + m - 1) // m) * m


def _pad_to(a, shape):
    pads = [(0, t - s) for s, t in zip(a.shape, shape)]
    return jnp.pad(a, pads)


# ---------------------------------------------------------------------------
# Kernel: one batch tile of the full VAE forward (5 linear layers fused to 4
# matmuls, ReLU, reparametrization, sigmoid). All weights are full VMEM blocks.
# ---------------------------------------------------------------------------
def vae_kernel(x_ref, eps_ref,
               w1_ref, b1_ref,     # img_2_hid            (in_pad, hid_pad)
               w23_ref, b23_ref,   # hid_2_mu | hid_2_sigma (hid_pad, 2*z_pad)
               w4_ref, b4_ref,     # z_2_hid              (z_pad, hid_pad)
               w5_ref, b5_ref,     # hid_2_img            (hid_pad, in_pad)
               xrec_ref, musig_ref):
    z_pad = eps_ref.shape[1]

    x = x_ref[...]  # bf16 (TB, in_pad)

    # ---- encode ----
    h = jnp.dot(x, w1_ref[...], preferred_element_type=jnp.float32) + b1_ref[...]
    h = jnp.maximum(h, 0.0)                                           # ReLU (f32)

    # fused mu|sigma projection: one MXU pass instead of two tiny ones
    ms = jnp.dot(h.astype(jnp.bfloat16), w23_ref[...],
                 preferred_element_type=jnp.float32) + b23_ref[...]
    mu = ms[:, :z_pad]          # static, 128-aligned slices
    sigma = ms[:, z_pad:]

    # ---- reparametrize (f32) ----
    z = mu + sigma * eps_ref[...]

    # ---- decode ----
    hd = jnp.dot(z.astype(jnp.bfloat16), w4_ref[...],
                 preferred_element_type=jnp.float32) + b4_ref[...]
    hd = jnp.maximum(hd, 0.0)                                         # ReLU (f32)
    logits = jnp.dot(hd.astype(jnp.bfloat16), w5_ref[...],
                     preferred_element_type=jnp.float32) + b5_ref[...]

    xrec_ref[...] = jax.nn.sigmoid(logits).astype(xrec_ref.dtype)
    musig_ref[...] = ms.astype(musig_ref.dtype)   # single lane-dense packed store


# ---------------------------------------------------------------------------
# Wrapper: pad to lane-dense shapes, cast MXU operands to bf16, tile the batch.
# ---------------------------------------------------------------------------
def vae_forward(x, eps, params, *, tb=128):
    """x: (B, input_dim) f32; eps: (B, z_dim) f32; params: dict of (W, b) f32.
    Returns (x_reconstructed, mu, sigma), each f32 at the unpadded shapes."""
    B, input_dim = x.shape
    z_dim = eps.shape[1]
    hid_dim = params["w1"].shape[1]

    in_pad = _round_up(input_dim, 128)
    hid_pad = _round_up(hid_dim, 128)
    z_pad = _round_up(z_dim, 128)
    b_pad = _round_up(B, tb)

    # --- zero-pad + cast operands (zero padding is exact: padded lanes/rows
    #     contribute exactly 0 through every downstream matmul) ---
    x_p = _pad_to(x, (b_pad, in_pad)).astype(jnp.bfloat16)
    eps_p = _pad_to(eps, (b_pad, z_pad))                                  # f32

    w1 = _pad_to(params["w1"], (in_pad, hid_pad)).astype(jnp.bfloat16)
    b1 = _pad_to(params["b1"], (1, hid_pad))
    w23 = jnp.concatenate([_pad_to(params["w2"], (hid_pad, z_pad)),
                           _pad_to(params["w3"], (hid_pad, z_pad))],
                          axis=1).astype(jnp.bfloat16)
    b23 = jnp.concatenate([_pad_to(params["b2"], (1, z_pad)),
                           _pad_to(params["b3"], (1, z_pad))], axis=1)
    w4 = _pad_to(params["w4"], (z_pad, hid_pad)).astype(jnp.bfloat16)
    b4 = _pad_to(params["b4"], (1, hid_pad))
    w5 = _pad_to(params["w5"], (hid_pad, in_pad)).astype(jnp.bfloat16)
    b5 = _pad_to(params["b5"], (1, in_pad))

    operands = (x_p, eps_p, w1, b1, w23, b23, w4, b4, w5, b5)

    # --- BlockSpecs: batch-tiled activations, grid-invariant resident weights ---
    def batch_spec(cols):
        return pl.BlockSpec((tb, cols), lambda i: (i, 0))

    def const_spec(a):
        return pl.BlockSpec(a.shape, lambda i: (0, 0))

    in_specs = [
        batch_spec(in_pad),            # x
        batch_spec(z_pad),             # eps
        const_spec(w1), const_spec(b1),
        const_spec(w23), const_spec(b23),
        const_spec(w4), const_spec(b4),
        const_spec(w5), const_spec(b5),
    ]
    out_specs = (batch_spec(in_pad), batch_spec(2 * z_pad))
    out_shape = (
        jax.ShapeDtypeStruct((b_pad, in_pad), jnp.float32),     # x_reconstructed
        jax.ShapeDtypeStruct((b_pad, 2 * z_pad), jnp.float32),  # packed mu | sigma
    )

    flops = 2 * b_pad * (in_pad * hid_pad + hid_pad * 2 * z_pad
                         + z_pad * hid_pad + hid_pad * in_pad)
    bytes_accessed = (sum(int(o.size) * o.dtype.itemsize for o in operands)
                      + sum(int(s.size) * s.dtype.itemsize for s in out_shape))
    cost = pl.CostEstimate(flops=flops,
                           transcendentals=b_pad * in_pad,       # sigmoid
                           bytes_accessed=bytes_accessed)

    xrec_p, musig_p = pl.pallas_call(
        vae_kernel,
        out_shape=out_shape,
        grid=(b_pad // tb,),
        in_specs=in_specs,
        out_specs=out_specs,
        compiler_params=pltpu.CompilerParams(
            dimension_semantics=("parallel",)),     # 2x on v7x's two TensorCores
        cost_estimate=cost,
    )(*operands)

    x_rec = xrec_p[:B, :input_dim]
    mu = musig_p[:B, :z_dim]
    sigma = musig_p[:B, z_pad:z_pad + z_dim]
    return x_rec, mu, sigma


# ---------------------------------------------------------------------------
# Parameter init mimicking nn.Linear's U(-1/sqrt(fan_in), 1/sqrt(fan_in)).
# Weights stored as (in, out).
# ---------------------------------------------------------------------------
def init_params(key, input_dim, hid_dim, z_dim):
    def linear(key, fan_in, fan_out):
        kw, kb = jax.random.split(key)
        bound = 1.0 / jnp.sqrt(float(fan_in))
        w = jax.random.uniform(kw, (fan_in, fan_out), jnp.float32, -bound, bound)
        b = jax.random.uniform(kb, (1, fan_out), jnp.float32, -bound, bound)
        return w, b

    k1, k2, k3, k4, k5 = jax.random.split(key, 5)
    w1, b1 = linear(k1, input_dim, hid_dim)   # img_2_hid
    w2, b2 = linear(k2, hid_dim, z_dim)       # hid_2_mu
    w3, b3 = linear(k3, hid_dim, z_dim)       # hid_2_sigma
    w4, b4 = linear(k4, z_dim, hid_dim)       # z_2_hid
    w5, b5 = linear(k5, hid_dim, input_dim)   # hid_2_img
    return dict(w1=w1, b1=b1, w2=w2, b2=b2, w3=w3, b3=b3,
                w4=w4, b4=b4, w5=w5, b5=b5)


def vae_reference(x, eps, p, dot_dtype=jnp.float32):
    """Plain-JAX reference of the PyTorch forward. dot_dtype controls the MXU
    input precision so it can mirror the kernel's bf16 matmul inputs."""
    def lin(a, w, b):
        return jnp.dot(a.astype(dot_dtype), w.astype(dot_dtype),
                       preferred_element_type=jnp.float32) + b

    h = jax.nn.relu(lin(x, p["w1"], p["b1"]))
    mu = lin(h, p["w2"], p["b2"])
    sigma = lin(h, p["w3"], p["b3"])
    z = mu + sigma * eps
    hd = jax.nn.relu(lin(z, p["w4"], p["b4"]))
    x_rec = jax.nn.sigmoid(lin(hd, p["w5"], p["b5"]))
    return x_rec, mu, sigma


if __name__ == "__main__":
    # Small but MXU-friendly test shapes: 256 rows (2 batch tiles of 128).
    B, INPUT_DIM, HID_DIM, Z_DIM = 256, 256, 200, 20

    key = jax.random.PRNGKey(0)
    k_params, k_x, k_eps = jax.random.split(key, 3)

    params = init_params(k_params, INPUT_DIM, HID_DIM, Z_DIM)
    x = jax.random.uniform(k_x, (B, INPUT_DIM), jnp.float32)
    # TODO(synk): torch.randn_like(sigma) is generated inside forward() in PyTorch;
    # here epsilon comes from host-side jax.random so the run is deterministic.
    eps = jax.random.normal(k_eps, (B, Z_DIM), jnp.float32)

    x_rec, mu, sigma = vae_forward(x, eps, params)
    jax.block_until_ready((x_rec, mu, sigma))

    # Tight check vs a reference that mirrors the kernel's bf16 matmul inputs.
    xr_bf, mu_bf, sg_bf = vae_reference(x, eps, params, dot_dtype=jnp.bfloat16)
    assert jnp.allclose(x_rec, xr_bf, atol=1e-3, rtol=1e-3)
    assert jnp.allclose(mu, mu_bf, atol=1e-3, rtol=1e-3)
    assert jnp.allclose(sigma, sg_bf, atol=1e-3, rtol=1e-3)

    # Loose sanity check vs the full-f32 reference (semantics of the module).
    xr_f32, mu_f32, sg_f32 = vae_reference(x, eps, params, dot_dtype=jnp.float32)
    assert jnp.allclose(x_rec, xr_f32, atol=5e-2, rtol=5e-2)
    assert jnp.allclose(mu, mu_f32, atol=5e-2, rtol=5e-2)
    assert jnp.allclose(sigma, sg_f32, atol=5e-2, rtol=5e-2)

    print("KERNEL_OK")
</pallas_src>

<mosaic_0001>
module attributes {stable_mosaic.version = 11 : i64} {
  func.func @vae_kernel(%arg0: i32, %arg1: memref<128x256xbf16, #tpu.memory_space<vmem>>, %arg2: memref<128x128xf32, #tpu.memory_space<vmem>>, %arg3: memref<256x256xbf16, #tpu.memory_space<vmem>>, %arg4: memref<1x256xf32, #tpu.memory_space<vmem>>, %arg5: memref<256x256xbf16, #tpu.memory_space<vmem>>, %arg6: memref<1x256xf32, #tpu.memory_space<vmem>>, %arg7: memref<128x256xbf16, #tpu.memory_space<vmem>>, %arg8: memref<1x256xf32, #tpu.memory_space<vmem>>, %arg9: memref<256x256xbf16, #tpu.memory_space<vmem>>, %arg10: memref<1x256xf32, #tpu.memory_space<vmem>>, %arg11: memref<128x256xf32, #tpu.memory_space<vmem>>, %arg12: memref<128x256xf32, #tpu.memory_space<vmem>>) attributes {dimension_semantics = [#tpu.dimension_semantics<parallel>], iteration_bounds = array<i64: 2>, scalar_prefetch = 0 : i64, scratch_operands = 0 : i64, tpu.core_type = #tpu.core_type<tc>, window_params = [{transform_indices = @transform_0, window_bounds = array<i64: 128, 256>}, {transform_indices = @transform_1, window_bounds = array<i64: 128, 128>}, {pipeline_mode = #tpu.pipeline_mode<synchronous>, transform_indices = @transform_2, window_bounds = array<i64: 256, 256>}, {pipeline_mode = #tpu.pipeline_mode<synchronous>, transform_indices = @transform_3, window_bounds = array<i64: 1, 256>}, {pipeline_mode = #tpu.pipeline_mode<synchronous>, transform_indices = @transform_4, window_bounds = array<i64: 256, 256>}, {pipeline_mode = #tpu.pipeline_mode<synchronous>, transform_indices = @transform_5, window_bounds = array<i64: 1, 256>}, {pipeline_mode = #tpu.pipeline_mode<synchronous>, transform_indices = @transform_6, window_bounds = array<i64: 128, 256>}, {pipeline_mode = #tpu.pipeline_mode<synchronous>, transform_indices = @transform_7, window_bounds = array<i64: 1, 256>}, {pipeline_mode = #tpu.pipeline_mode<synchronous>, transform_indices = @transform_8, window_bounds = array<i64: 256, 256>}, {pipeline_mode = #tpu.pipeline_mode<synchronous>, transform_indices = @transform_9, window_bounds = array<i64: 1, 256>}, {transform_indices = @transform_10, window_bounds = array<i64: 128, 256>}, {transform_indices = @transform_11, window_bounds = array<i64: 128, 256>}]} {
    %c0 = arith.constant 0 : index
    %c0_0 = arith.constant 0 : index
    %0 = vector.load %arg1[%c0, %c0_0] : memref<128x256xbf16, #tpu.memory_space<vmem>>, vector<128x256xbf16>
    %c0_1 = arith.constant 0 : index
    %c0_2 = arith.constant 0 : index
    %1 = vector.load %arg3[%c0_1, %c0_2] : memref<256x256xbf16, #tpu.memory_space<vmem>>, vector<256x256xbf16>
    %cst = arith.constant dense<0.000000e+00> : vector<128x256xf32>
    %2 = tpu.matmul %0, %1, %cst {dimension_numbers = #tpu.dot_dimension_numbers<[1], [0], [0], [1], [0, 0, 1, 1], [], []>} : vector<128x256xbf16>, vector<256x256xbf16>, vector<128x256xf32> -> vector<128x256xf32>
    %c0_3 = arith.constant 0 : index
    %c0_4 = arith.constant 0 : index
    %3 = vector.load %arg4[%c0_3, %c0_4] : memref<1x256xf32, #tpu.memory_space<vmem>>, vector<1x256xf32>
    %4 = vector.broadcast %3 : vector<1x256xf32> to vector<128x256xf32>
    %5 = arith.addf %2, %4 : vector<128x256xf32>
    %cst_5 = arith.constant 0.000000e+00 : f32
    %6 = vector.broadcast %cst_5 : f32 to vector<128x256xf32>
    %7 = arith.maximumf %5, %6 : vector<128x256xf32>
    %8 = arith.truncf %7 : vector<128x256xf32> to vector<128x256xbf16>
    %c0_6 = arith.constant 0 : index
    %c0_7 = arith.constant 0 : index
    %9 = vector.load %arg5[%c0_6, %c0_7] : memref<256x256xbf16, #tpu.memory_space<vmem>>, vector<256x256xbf16>
    %cst_8 = arith.constant dense<0.000000e+00> : vector<128x256xf32>
    %10 = tpu.matmul %8, %9, %cst_8 {dimension_numbers = #tpu.dot_dimension_numbers<[1], [0], [0], [1], [0, 0, 1, 1], [], []>} : vector<128x256xbf16>, vector<256x256xbf16>, vector<128x256xf32> -> vector<128x256xf32>
    %c0_9 = arith.constant 0 : index
    %c0_10 = arith.constant 0 : index
    %11 = vector.load %arg6[%c0_9, %c0_10] : memref<1x256xf32, #tpu.memory_space<vmem>>, vector<1x256xf32>
    %12 = vector.broadcast %11 : vector<1x256xf32> to vector<128x256xf32>
    %13 = arith.addf %10, %12 : vector<128x256xf32>
    %14 = vector.extract_strided_slice %13 {offsets = [0, 0], sizes = [128, 128], strides = [1, 1]} : vector<128x256xf32> to vector<128x128xf32>
    %15 = vector.extract_strided_slice %13 {offsets = [0, 128], sizes = [128, 128], strides = [1, 1]} : vector<128x256xf32> to vector<128x128xf32>
    %c0_11 = arith.constant 0 : index
    %c0_12 = arith.constant 0 : index
    %16 = vector.load %arg2[%c0_11, %c0_12] : memref<128x128xf32, #tpu.memory_space<vmem>>, vector<128x128xf32>
    %17 = arith.mulf %15, %16 : vector<128x128xf32>
    %18 = arith.addf %14, %17 : vector<128x128xf32>
    %19 = arith.truncf %18 : vector<128x128xf32> to vector<128x128xbf16>
    %c0_13 = arith.constant 0 : index
    %c0_14 = arith.constant 0 : index
    %20 = vector.load %arg7[%c0_13, %c0_14] : memref<128x256xbf16, #tpu.memory_space<vmem>>, vector<128x256xbf16>
    %cst_15 = arith.constant dense<0.000000e+00> : vector<128x256xf32>
    %21 = tpu.matmul %19, %20, %cst_15 {dimension_numbers = #tpu.dot_dimension_numbers<[1], [0], [0], [1], [0, 0, 1, 1], [], []>} : vector<128x128xbf16>, vector<128x256xbf16>, vector<128x256xf32> -> vector<128x256xf32>
    %c0_16 = arith.constant 0 : index
    %c0_17 = arith.constant 0 : index
    %22 = vector.load %arg8[%c0_16, %c0_17] : memref<1x256xf32, #tpu.memory_space<vmem>>, vector<1x256xf32>
    %23 = vector.broadcast %22 : vector<1x256xf32> to vector<128x256xf32>
    %24 = arith.addf %21, %23 : vector<128x256xf32>
    %cst_18 = arith.constant 0.000000e+00 : f32
    %25 = vector.broadcast %cst_18 : f32 to vector<128x256xf32>
    %26 = arith.maximumf %24, %25 : vector<128x256xf32>
    %27 = arith.truncf %26 : vector<128x256xf32> to vector<128x256xbf16>
    %c0_19 = arith.constant 0 : index
    %c0_20 = arith.constant 0 : index
    %28 = vector.load %arg9[%c0_19, %c0_20] : memref<256x256xbf16, #tpu.memory_space<vmem>>, vector<256x256xbf16>
    %cst_21 = arith.constant dense<0.000000e+00> : vector<128x256xf32>
    %29 = tpu.matmul %27, %28, %cst_21 {dimension_numbers = #tpu.dot_dimension_numbers<[1], [0], [0], [1], [0, 0, 1, 1], [], []>} : vector<128x256xbf16>, vector<256x256xbf16>, vector<128x256xf32> -> vector<128x256xf32>
    %c0_22 = arith.constant 0 : index
    %c0_23 = arith.constant 0 : index
    %30 = vector.load %arg10[%c0_22, %c0_23] : memref<1x256xf32, #tpu.memory_space<vmem>>, vector<1x256xf32>
    %31 = vector.broadcast %30 : vector<1x256xf32> to vector<128x256xf32>
    %32 = arith.addf %29, %31 : vector<128x256xf32>
    %33 = arith.negf %32 : vector<128x256xf32>
    %34 = math.exp %33 : vector<128x256xf32>
    %cst_24 = arith.constant 1.000000e+00 : f32
    %35 = vector.broadcast %cst_24 : f32 to vector<128x256xf32>
    %36 = arith.addf %35, %34 : vector<128x256xf32>
    %37 = arith.divf %35, %36 : vector<128x256xf32>
    %c0_25 = arith.constant 0 : index
    %c0_26 = arith.constant 0 : index
    %38 = vector.load %arg11[%c0_25, %c0_26] : memref<128x256xf32, #tpu.memory_space<vmem>>, vector<128x256xf32>
    tpu.vector_store %arg11[%c0_25, %c0_26], %37 {strides = array<i32>} : memref<128x256xf32, #tpu.memory_space<vmem>>, vector<128x256xf32>,
    %c0_27 = arith.constant 0 : index
    %c0_28 = arith.constant 0 : index
    %39 = vector.load %arg12[%c0_27, %c0_28] : memref<128x256xf32, #tpu.memory_space<vmem>>, vector<128x256xf32>
    tpu.vector_store %arg12[%c0_27, %c0_28], %13 {strides = array<i32>} : memref<128x256xf32, #tpu.memory_space<vmem>>, vector<128x256xf32>,
    return
  }
  func.func @transform_0(%arg0: i32) -> (i32, i32) {
    %c0_i32 = arith.constant 0 : i32
    %c0_i32_0 = arith.constant 0 : i32
    return %arg0, %c0_i32 : i32, i32
  }
  func.func @transform_1(%arg0: i32) -> (i32, i32) {
    %c0_i32 = arith.constant 0 : i32
    %c0_i32_0 = arith.constant 0 : i32
    return %arg0, %c0_i32 : i32, i32
  }
  func.func @transform_2(%arg0: i32) -> (i32, i32) {
    %c0_i32 = arith.constant 0 : i32
    %c0_i32_0 = arith.constant 0 : i32
    %c0_i32_1 = arith.constant 0 : i32
    return %c0_i32, %c0_i32_0 : i32, i32
  }
  func.func @transform_3(%arg0: i32) -> (i32, i32) {
    %c0_i32 = arith.constant 0 : i32
    %c0_i32_0 = arith.constant 0 : i32
    %c0_i32_1 = arith.constant 0 : i32
    return %c0_i32, %c0_i32_0 : i32, i32
  }
  func.func @transform_4(%arg0: i32) -> (i32, i32) {
    %c0_i32 = arith.constant 0 : i32
    %c0_i32_0 = arith.constant 0 : i32
    %c0_i32_1 = arith.constant 0 : i32
    return %c0_i32, %c0_i32_0 : i32, i32
  }
  func.func @transform_5(%arg0: i32) -> (i32, i32) {
    %c0_i32 = arith.constant 0 : i32
    %c0_i32_0 = arith.constant 0 : i32
    %c0_i32_1 = arith.constant 0 : i32
    return %c0_i32, %c0_i32_0 : i32, i32
  }
  func.func @transform_6(%arg0: i32) -> (i32, i32) {
    %c0_i32 = arith.constant 0 : i32
    %c0_i32_0 = arith.constant 0 : i32
    %c0_i32_1 = arith.constant 0 : i32
    return %c0_i32, %c0_i32_0 : i32, i32
  }
  func.func @transform_7(%arg0: i32) -> (i32, i32) {
    %c0_i32 = arith.constant 0 : i32
    %c0_i32_0 = arith.constant 0 : i32
    %c0_i32_1 = arith.constant 0 : i32
    return %c0_i32, %c0_i32_0 : i32, i32
  }
  func.func @transform_8(%arg0: i32) -> (i32, i32) {
    %c0_i32 = arith.constant 0 : i32
    %c0_i32_0 = arith.constant 0 : i32
    %c0_i32_1 = arith.constant 0 : i32
    return %c0_i32, %c0_i32_0 : i32, i32
  }
  func.func @transform_9(%arg0: i32) -> (i32, i32) {
    %c0_i32 = arith.constant 0 : i32
    %c0_i32_0 = arith.constant 0 : i32
    %c0_i32_1 = arith.constant 0 : i32
    return %c0_i32, %c0_i32_0 : i32, i32
  }
  func.func @transform_10(%arg0: i32) -> (i32, i32) {
    %c0_i32 = arith.constant 0 : i32
    %c0_i32_0 = arith.constant 0 : i32
    return %arg0, %c0_i32 : i32, i32
  }
  func.func @transform_11(%arg0: i32) -> (i32, i32) {
    %c0_i32 = arith.constant 0 : i32
    %c0_i32_0 = arith.constant 0 : i32
    return %arg0, %c0_i32 : i32, i32
  }
}

</mosaic_0001>

<bundles_post_ra>
// kernel: tpu_custom_call.1
= control target key start
LH: loop header
LB: loop body
LE: loop exit
PB: predicated region body
PF: predicated region fallthrough
CT: control target
= control target key end

     0   :  { %s4051_s0 = inlined_call_operand.hbm [shape: bf16[256,256], index: 0, kind: input, shape index: {}]   ;;  %s4052_s1 = inlined_call_operand.hbm [shape: f32[256,128], index: 1, kind: input, shape index: {}]   ;;  %s4053_s2 = inlined_call_operand.hbm [shape: bf16[256,256], index: 2, kind: input, shape index: {}]   ;;  %s4054_s3 = inlined_call_operand.vmem [shape: f32[1,256], index: 3, kind: input, shape index: {}]   ;;  %s4055_s4 = inlined_call_operand.hbm [shape: bf16[256,256], index: 4, kind: input, shape index: {}]   ;;  %s4056_s5 = inlined_call_operand.vmem [shape: f32[1,256], index: 5, kind: input, shape index: {}]   ;;  %s4057_s6 = inlined_call_operand.hbm [shape: bf16[128,256], index: 6, kind: input, shape index: {}]   ;;  %s4058_s7 = inlined_call_operand.vmem [shape: f32[1,256], index: 7, kind: input, shape index: {}]   ;;  %s4059_s8 = inlined_call_operand.hbm [shape: bf16[256,256], index: 8, kind: input, shape index: {}]   ;;  %s4060_s9 = inlined_call_operand.vmem [shape: f32[1,256], index: 9, kind: input, shape index: {}]   ;;  %s4061_s10 = inlined_call_operand.hbm [shape: f32[256,256], index: 10, kind: output, shape index: {0}]   ;;  %s4062_s11 = inlined_call_operand.hbm [shape: f32[256,256], index: 11, kind: output, shape index: {1}]  }
   0x1   :  { %4074 = sst [smem:[#allocation25_spill]] %s4051_s0 }
   0x2   :  { %4075 = sst [smem:[#allocation26_spill]] %s4053_s2 }
   0x3   :  { %4076 = sst [smem:[#allocation27_spill]] %s4055_s4 }
   0x4   :  { %4077 = sst [smem:[#allocation28_spill]] %s4060_s9 }
   0x5   :  { %4078 = sst [smem:[#allocation29_spill]] %s4061_s10 }
   0x6   :  { %4079 = sst [smem:[#allocation30_spill]] %s4062_s11 }
   0x7   :  { %17 = vsyncpa [#allocation3], 0 }
   0x8   :  { %19 = vsyncpa [#allocation3 + $0x1], 0 }
   0x9   :  { %20 = vsyncpa [#allocation6], 0 }
   0xa   :  { %22 = vsyncpa [#allocation6 + $0x1], 0 }
   0xb   :  { %23 = vsyncpa [#allocation9], 0 }
   0xc   :  { %24 = vsyncpa [#allocation12], 0 }
   0xd   :  { %25 = vsyncpa [#allocation4], 0 }
   0xe   :  { %27 = vsyncpa [#allocation4 + $0x1], 0 }
   0xf   :  { %28 = vsyncpa [#allocation15], 0 }
  0x10   :  { %30 = vsyncpa [#allocation15 + $0x1], 0  ;;  %s3382_s17 = smov 0   ;;  %s3384_s18 = smov 0  }
  0x11   :  { %s3386_s19 = smov 0   ;;  %s3388_s20 = smov 0  }
  0x12 LB: > { %4080 = sst [smem:[#allocation23_spill]] %s3295_s17  ;;  %s3403_s21 = sadd.s32 4294967295, %s3307_s20   ;;  %s3307_s20 = sphi %s3388_s20, %s4113_s20   ;;  %s3303_s19 = sphi %s3386_s19, %s4112_s19   ;;  %s3299_s18 = sphi %s3384_s18, %s4111_s18   ;;  %s3295_s17 = sphi %s3382_s17, %s4110_s17  }
  0x13   : > { %s2399_s22 = sadd.s32 4294967294, %s3307_s20   ;;  %p56_p0 = scmp.ne.s32.totalorder %s3299_s18, %s3295_s17 }
  0x14   : > { %p4064_p1 = scmp.eq.s32.totalorder %s3403_s21, 0  ;;  %p280_p3 = scmp.eq.s32.totalorder %s2399_s22, 1 }
  0x15   : > { %p2400_p5 = scmp.ge.s32.totalorder %s3307_s20, 1  ;;  %p313_p7 = scmp.lt.s32.totalorder %s3307_s20, 3 }
  0x16   : > { %p3412_p4 = por %p4064_p1, %p56_p0  ;;  %p3417_p6 = por %p280_p3, %p56_p0 }
  0x17   : > { %p3422_p8 = pnand %p2400_p5, %p313_p7  ;;  %s3309_s26 = smov [#allocation7]  }
  0x18   : > { %s4081_s23 = scalar_select %p3412_p4, 1, 0 }
  0x19   : > { %s4082_s24 = scalar_select %p3417_p6, 1, 0 }
  0x1a   : > { %s4084_s25 = scalar_select %p3422_p8, 1, 0 }
  0x1b   : > { %4083 = sst [smem:[#allocation24_spill]] %s4082_s24  ;;  %s325_s27 = sshll.u32 %s3309_s26, 4  ;;  %s3426_s27 = int_to_ptr.vmem [resolvable:$true] %s325_s27 }
  0x1c   : > { %p2623_p9 = pneg %p3422_p8  ;;  %s3310_s29 = smov [#allocation8]  }
  0x1d   : > { %s341_s30 = sshll.u32 %s3310_s29, 4  ;;  %s3311_s12 = smov [#allocation10]   ;;  %s3437_s30 = int_to_ptr.vmem [resolvable:$true] %s341_s30 }
  0x1e   : > { %p3433_p11 = pnand %p2623_p9, %p4064_p1  ;;  %s3439_s13 = sshll.u32 %s3311_s12, 4  ;;  %s358_s13 = int_to_ptr.vmem [resolvable:$true] %s3439_s13 }
  0x1f   : > { %s4086_s2 = sld [smem:[#allocation26_spill]] }
  0x20   : > { %p3449_p13 = pneg %p3433_p11 }
  0x25   : > { %s3021_s16 = scalar_lea.hbm %s4086_s2, 4096 }
  0x26   : > { %p3022_p12 = scmp.ne.s32.totalorder %s4086_s2, %s3021_s16  ;;  %p3028_p5 = scmp.lt.u32.totalorder %s3021_s16, %s4086_s2 }
  0x28   : > { %p3024_p0 = pnand %p3449_p13, %p3022_p12 }
  0x2a   : > { %p3025_p3 = pneg %p3024_p0 }
  0x2c   : > { %p3030_p7 = pnand %p3028_p5, %p3025_p3 }
  0x2e   : > { %3033 = shalt.err (!%p3030_p7)
}
  0x2f   : > { %s3034_s14 = scalar_lea.vmem %s3426_s27, 4096  ;;  %p3042_p2 = scmp.lt.s32.totalorder %s3426_s27, %s3426_s27 }
  0x30   : > { %p3035_p9 = scmp.ne.s32.totalorder %s3426_s27, %s3034_s14  ;;  %p3043_p6 = scmp.lt.s32.totalorder %s3034_s14, %s3034_s14 }
  0x32   : > { %p3037_p10 = pnand %p3035_p9, %p3449_p13  ;;  %p3044_p12 = por %p3043_p6, %p3042_p2 }
  0x34   : > { %p3038_p1 = pneg %p3037_p10 }
  0x36   : > { %p3045_p0 = pnand %p3044_p12, %p3038_p1 }
  0x38   : > { %3048 = shalt.err (!%p3045_p0)
}
  0x39   : > { %s4070_s15 = smov 128   ;;  %s4072_s16 = smov 8  }
  0x3a   : > { %2626 = dma.hbm_to_vmem [thread:$0]  (!%p3433_p11), %s4086_s2, 4096, %s3426_s27, [#allocation6], %s4070_s15, %s4070_s15, %s4072_s16  }
  0x3b   : > { %s4088_s4 = sld [smem:[#allocation27_spill]] }
  0x41   : > { %s3049_s14 = scalar_lea.hbm %s4088_s4, 4096 }
  0x42   : > { %p3050_p1 = scmp.ne.s32.totalorder %s4088_s4, %s3049_s14  ;;  %p3056_p10 = scmp.lt.u32.totalorder %s3049_s14, %s4088_s4 }
  0x44   : > { %p3052_p2 = pnand %p3050_p1, %p3449_p13 }
  0x46   : > { %p3053_p6 = pneg %p3052_p2 }
  0x48   : > { %p3058_p3 = pnand %p3056_p10, %p3053_p6 }
  0x4a   : > { %3061 = shalt.err (!%p3058_p3)
}
  0x4b   : > { %s3062_s27 = scalar_lea.vmem %s3437_s30, 4096  ;;  %p3070_p12 = scmp.lt.s32.totalorder %s3437_s30, %s3437_s30 }
  0x4c   : > { %p3063_p5 = scmp.ne.s32.totalorder %s3437_s30, %s3062_s27  ;;  %p3071_p0 = scmp.lt.s32.totalorder %s3062_s27, %s3062_s27 }
  0x4e   : > { %p3065_p7 = pnand %p3063_p5, %p3449_p13  ;;  %p3072_p1 = por %p3071_p0, %p3070_p12 }
  0x50   : > { %p3066_p9 = pneg %p3065_p7 }
  0x52   : > { %p3073_p2 = pnand %p3072_p1, %p3066_p9 }
  0x54   : > { %3076 = shalt.err (!%p3073_p2)
}
  0x55   : > { %2629 = dma.hbm_to_vmem [thread:$0]  (!%p3433_p11), %s4088_s4, 4096, %s3437_s30, [#allocation9], %s4070_s15, %s4070_s15, %s4072_s16  }
  0x56   : > { %s3077_s22 = scalar_lea.hbm %s4057_s6, 2048 }
  0x57   : > { %p3078_p6 = scmp.ne.s32.totalorder %s4057_s6, %s3077_s22  ;;  %p3084_p5 = scmp.lt.u32.totalorder %s3077_s22, %s4057_s6 }
  0x59   : > { %p3080_p10 = pnand %p3078_p6, %p3449_p13 }
  0x5b   : > { %p3081_p3 = pneg %p3080_p10 }
  0x5d   : > { %p3086_p7 = pnand %p3084_p5, %p3081_p3 }
  0x5f   : > { %3089 = shalt.err (!%p3086_p7)
}
  0x60   : > { %s3090_s27 = scalar_lea.vmem %s358_s13, 2048  ;;  %p3098_p1 = scmp.lt.s32.totalorder %s358_s13, %s358_s13 }
  0x61   : > { %p3091_p9 = scmp.ne.s32.totalorder %s358_s13, %s3090_s27  ;;  %p3099_p2 = scmp.lt.s32.totalorder %s3090_s27, %s3090_s27 }
  0x63   : > { %p3093_p12 = pnand %p3091_p9, %p3449_p13  ;;  %p3100_p4 = por %p3099_p2, %p3098_p1 }
  0x65   : > { %p3094_p0 = pneg %p3093_p12 }
  0x67   : > { %p3101_p8 = pnand %p3100_p4, %p3094_p0 }
  0x69   : > { %3104 = shalt.err (!%p3101_p8)
}
  0x6a   : > { %2632 = dma.hbm_to_vmem [thread:$0]  (!%p3433_p11), %s4057_s6, 2048, %s358_s13, [#allocation9], %s4070_s15, %s4070_s15, %s4072_s16  }
  0x6b   : > { %s3314_s10 = smov [#allocation11]   ;;  %s3105_s26 = scalar_lea.hbm %s4059_s8, 4096 }
  0x6c   : > { %s373_s11 = sshll.u32 %s3314_s10, 4  ;;  %p3106_p4 = scmp.ne.s32.totalorder %s4059_s8, %s3105_s26  ;;  %s374_s11 = int_to_ptr.vmem [resolvable:$true] %s373_s11 }
  0x6d   : > { %p3112_p10 = scmp.lt.u32.totalorder %s3105_s26, %s4059_s8 }
  0x6e   : > { %p3108_p8 = pnand %p3106_p4, %p3449_p13 }
  0x70   : > { %p3109_p6 = pneg %p3108_p8 }
  0x72   : > { %p3114_p3 = pnand %p3112_p10, %p3109_p6 }
  0x74   : > { %3117 = shalt.err (!%p3114_p3)
}
  0x75   : > { %s3118_s13 = scalar_lea.vmem %s374_s11, 4096  ;;  %p3126_p12 = scmp.lt.s32.totalorder %s374_s11, %s374_s11 }
  0x76   : > { %p3119_p5 = scmp.ne.s32.totalorder %s374_s11, %s3118_s13  ;;  %p3127_p0 = scmp.lt.s32.totalorder %s3118_s13, %s3118_s13 }
  0x78   : > { %p3121_p7 = pnand %p3119_p5, %p3449_p13  ;;  %p3128_p1 = por %p3127_p0, %p3126_p12 }
  0x7a   : > { %p3122_p9 = pneg %p3121_p7 }
  0x7c   : > { %p3129_p2 = pnand %p3128_p1, %p3122_p9 }
  0x7e   : > { %3132 = shalt.err (!%p3129_p2)
}
  0x7f   : > { %2635 = dma.hbm_to_vmem [thread:$0]  (!%p3433_p11), %s4059_s8, 4096, %s374_s11, [#allocation12], %s4070_s15, %s4070_s15, %s4072_s16  }
  0x80   : > { %s3543_s24 = sadd.s32 1, %s3307_s20   ;;  %s43_s28 = sadd.s32 1, %s3303_s19 }
  0x81   : > { %s40_s10 = ssub.s32 %s3307_s20, %s3543_s24  ;;  %p50_p13 = scmp.ne.s32.totalorder %s3303_s19, %s3299_s18 }
  0x82   : > { %p41_p4 = scmp.eq.s32.totalorder %s40_s10, 0  ;;  %p51_p8 = scmp.eq.s32.totalorder %s3307_s20, 0 }
  0x83   : > { %p4089_p6 = scmp.eq.s32.totalorder %s3403_s21, 1  ;;  %p2654_p3 = scmp.lt.s32.totalorder %s3307_s20, 2 }
  0x84   : > { %s3559_s22 = scalar_select %p41_p4, %s3303_s19, %s43_s28  }
  0x85   : > { %p3553_p10 = por %p4089_p6, %p50_p13  ;;  %p52_p5 = por %p51_p8, %p50_p13 }
  0x86   : > { %s390_s26 = sand.u32 1, %s3303_s19   ;;  %s2593_s11 = sshll.u32 %s3307_s20, 11 }
  0x87   : > { %s2406_s29 = sshll.u32 %s390_s26, 7  ;;  %s4091_s0 = sld [smem:[#allocation25_spill]] }
  0x88   : > { %s394_s13 = scalar_lea.vmem [#allocation2], %s2406_s29  ;;  %p3570_p11 = pnand %p2654_p3, %p52_p5 }
  0x89   : > { %s402_s30 = sshll.u32 %s394_s13, 4  ;;  %s3577_s12 = scalar_lea.hbm %s4052_s1, %s2593_s11  ;;  %s3568_s30 = int_to_ptr.vmem [resolvable:$true] %s402_s30 }
  0x8a   : > { %s416_s14 = scalar_lea.vmem [#allocation5], %s2406_s29  ;;  %s3581_s16 = scalar_lea.sflag [#allocation3], %s390_s26 }
  0x8b   : > { %s3579_s15 = sshll.u32 %s416_s14, 4  ;;  %p3135_p9 = pneg %p3570_p11  ;;  %s3613_s15 = int_to_ptr.vmem [resolvable:$true] %s3579_s15 }
  0x8d   : > { %s3566_s27 = scalar_lea.hbm %s4091_s0, %s2593_s11  ;;  %s3138_s28 = scalar_lea.hbm %s4091_s0, 4096 }
  0x8e   : > { %s3133_s13 = scalar_lea.hbm %s3566_s27, 2048  ;;  %p3139_p1 = scmp.lt.u32.totalorder %s3566_s27, %s4091_s0 }
  0x8f   : > { %p3134_p7 = scmp.ne.s32.totalorder %s3566_s27, %s3133_s13  ;;  %p3140_p2 = scmp.lt.u32.totalorder %s3138_s28, %s3133_s13 }
  0x90   : > { %p3142_p4 = scmp.lt.u32.totalorder %s3133_s13, %s3566_s27 }
  0x91   : > { %p3136_p12 = pnand %p3135_p9, %p3134_p7  ;;  %p3141_p13 = por %p3140_p2, %p3139_p1 }
  0x93   : > { %p3137_p0 = pneg %p3136_p12  ;;  %p3143_p8 = por %p3142_p4, %p3141_p13 }
  0x95   : > { %p3144_p6 = pnand %p3143_p8, %p3137_p0 }
  0x97   : > { %3147 = shalt.err (!%p3144_p6)
}
  0x98   : > { %s3148_s26 = scalar_lea.vmem %s3568_s30, 2048  ;;  %s3315_s2 = smov [#allocation2]  }
  0x99   : > { %p3149_p3 = scmp.ne.s32.totalorder %s3568_s30, %s3148_s26  ;;  %s3153_s4 = sshll.u32 %s3315_s2, 4  ;;  %s3154_s4 = int_to_ptr.vmem [resolvable:$false] %s3153_s4 }
  0x9a   : > { %s3155_s29 = scalar_lea.vmem %s3154_s4, 4096  ;;  %p3156_p12 = scmp.lt.s32.totalorder %s3568_s30, %s3154_s4 }
  0x9b   : > { %p3151_p5 = pnand %p3149_p3, %p3135_p9  ;;  %p3157_p1 = scmp.lt.s32.totalorder %s3155_s29, %s3148_s26 }
  0x9d   : > { %p3152_p7 = pneg %p3151_p5  ;;  %p3158_p2 = por %p3157_p1, %p3156_p12 }
  0x9f   : > { %p3159_p13 = pnand %p3158_p2, %p3152_p7 }
  0xa1   : > { %3162 = shalt.err (!%p3159_p13)
}
  0xa2   : > { %s4093_s14 = smov 8   ;;  %s4094_s13 = smov 128  }
  0xa3   : > { %2639 = dma.hbm_to_vmem [thread:$0]  (!%p3570_p11), %s3566_s27, 2048, %s3568_s30, %s3581_s16, %s4094_s13, %s4094_s13, %s4093_s14  }
  0xa4   : > { %s412_s28 = sand.u32 1, %s3307_s20   ;;  %s3163_s11 = scalar_lea.hbm %s3577_s12, 2048 }
  0xa5   : > { %s3616_s10 = scalar_lea.sflag [#allocation6], %s412_s28  ;;  %p3164_p0 = scmp.ne.s32.totalorder %s3577_s12, %s3163_s11 }
  0xa6   : > { %s3168_s4 = scalar_lea.hbm %s4052_s1, 4096  ;;  %p3169_p6 = scmp.lt.u32.totalorder %s3577_s12, %s4052_s1 }
  0xa7   : > { %p3166_p4 = pnand %p3164_p0, %p3135_p9  ;;  %p3170_p3 = scmp.lt.u32.totalorder %s3168_s4, %s3163_s11 }
  0xa8   : > { %p3172_p7 = scmp.lt.u32.totalorder %s3163_s11, %s3577_s12 }
  0xa9   : > { %p3167_p8 = pneg %p3166_p4  ;;  %p3171_p5 = por %p3170_p3, %p3169_p6 }
  0xab   : > { %p3173_p12 = por %p3172_p7, %p3171_p5 }
  0xad   : > { %p3174_p1 = pnand %p3173_p12, %p3167_p8 }
  0xaf   : > { %3177 = shalt.err (!%p3174_p1)
}
  0xb0   : > { %s3178_s16 = scalar_lea.vmem %s3613_s15, 2048  ;;  %s3316_s27 = smov [#allocation5]  }
  0xb1   : > { %p3179_p2 = scmp.ne.s32.totalorder %s3613_s15, %s3178_s16  ;;  %s3183_s30 = sshll.u32 %s3316_s27, 4  ;;  %s3184_s30 = int_to_ptr.vmem [resolvable:$false] %s3183_s30 }
  0xb2   : > { %s3185_s0 = scalar_lea.vmem %s3184_s30, 4096  ;;  %p3186_p4 = scmp.lt.s32.totalorder %s3613_s15, %s3184_s30 }
  0xb3   : > { %p3181_p13 = pnand %p3179_p2, %p3135_p9  ;;  %p3187_p6 = scmp.lt.s32.totalorder %s3185_s0, %s3178_s16 }
  0xb5   : > { %p3182_p0 = pneg %p3181_p13  ;;  %p3188_p3 = por %p3187_p6, %p3186_p4 }
  0xb7   : > { %p3189_p5 = pnand %p3188_p3, %p3182_p0 }
  0xb9   : > { %3192 = shalt.err (!%p3189_p5)
}
  0xba   : > { %2642 = dma.hbm_to_vmem [thread:$0]  (!%p3570_p11), %s3577_s12, 2048, %s3613_s15, %s3616_s10, %s4094_s13, %s4094_s13, %s4093_s14  }
  0xbb   : > { %p4095_p9 = scmp.ne.s32.totalorder %s4084_s25, 0 }
  0xbc   : > { %s3648_s28 = sand.u32 (!%p4095_p9), 1, %s3299_s18   ;;  %p4096_p8 = scmp.ne.s32.totalorder (!%p4095_p9), %s4081_s23, 0 }
  0xbd   : > { %435 = sbr.rel (%p4095_p9) target bundleno = 1258 (0x4ea), region = 60  ;;  %s2414_s11 = sshll.u32 (!%p4095_p9), %s3648_s28, 7 }
  0xbe   : > { %s438_s26 = scalar_lea.sflag (!%p4095_p9), [#allocation3], %s3648_s28  ;;  %s3652_s2 = scalar_lea.vmem (!%p4095_p9), [#allocation2], %s2414_s11 }
  0xc4   : > { %3266 = dma.done.wait (%p4096_p8), %s438_s26, 2048  }
  0xc5   : > { %3268 = vsyncadd (%p4096_p8), %s438_s26, 4294965248  ;;  %s446_s15 = sand.u32 1, %s3403_s21   ;;  %s3659_s9 = scalar_lea.vmem [#allocation5], %s2414_s11 }
  0xc6   : > { %s447_s25 = scalar_lea.sflag [#allocation6], %s446_s15 }
  0xc7   : > { %3270 = dma.done.wait (%p4096_p8), %s447_s25, 2048  }
  0xc8   : > { %3272 = vsyncadd (%p4096_p8), %s447_s25, 4294965248  ;;  %p4097_p11 = scmp.eq.s32.totalorder %s3403_s21, 0 }
  0xca   : > { %3274 = dma.done.wait (%p4097_p11), [#allocation6], 4096   ;;  %p4098_p7 = pmov %p4097_p11 }
  0xcc   : > { %3276 = vsyncadd (%p4098_p7), [#allocation6], 4294963200  ;;  %p4099_p12 = pmov %p4098_p7 }
  0xcd   : > { %p4100_p1 = pmov %p4098_p7 }
  0xce   : > { %3278 = dma.done.wait (%p4099_p12), [#allocation9], 6144  }
  0xcf   : > { %3280 = vsyncadd (%p4100_p1), [#allocation9], 4294961152  ;;  %p4101_p2 = pmov %p4100_p1 }
  0xd0   : > { %p4102_p13 = pmov %p4100_p1 }
  0xd1   : > { %3282 = dma.done.wait (%p4101_p2), [#allocation12], 4096  }
  0xd2   : > { %3284 = vsyncadd (%p4102_p13), [#allocation12], 4294963200  ;;  %v2701_v0 = vld [vmem:[#allocation7 + $0x4] ss:$8 sps:$4 sm:$0xff]   ;;  %v2703_v1 = vld [vmem:[#allocation7] ss:$8 sps:$4 sm:$0xff]  }
  0xd3   : > { %820 = vmatprep.subr.bf16.mxu0 %v2701_v0  ;;  %v2704_v2 = vld [vmem:[#allocation7 + $0x14] ss:$8 sps:$4 sm:$0xff]   ;;  %v2706_v3 = vld [vmem:[#allocation7 + $0x10] ss:$8 sps:$4 sm:$0xff]   ;;  %v2707_v4 = vld [vmem:[#allocation7 + $0x24] ss:$8 sps:$4 sm:$0xff]  }
  0xd4   : > { %821 = vmatpush1.bf16.msra.mxu0 %v2703_v1  ;;  %v2709_v5 = vld [vmem:[#allocation7 + $0x20] ss:$8 sps:$4 sm:$0xff]   ;;  %v2710_v6 = vld [vmem:[#allocation7 + $0x34] ss:$8 sps:$4 sm:$0xff]   ;;  %v2712_v7 = vld [vmem:[#allocation7 + $0x30] ss:$8 sps:$4 sm:$0xff]  }
  0xd5   : > { %822 = vmatprep.subr.bf16.mxu0 %v2704_v2  ;;  %v2713_v8 = vld [vmem:[#allocation7 + $0x44] ss:$8 sps:$4 sm:$0xff]   ;;  %v2715_v9 = vld [vmem:[#allocation7 + $0x40] ss:$8 sps:$4 sm:$0xff]   ;;  %v2716_v10 = vld [vmem:[#allocation7 + $0x54] ss:$8 sps:$4 sm:$0xff]  }
  0xd6   : > { %v2718_v11 = vld [vmem:[#allocation7 + $0x50] ss:$8 sps:$4 sm:$0xff]   ;;  %v2719_v12 = vld [vmem:[#allocation7 + $0x64] ss:$8 sps:$4 sm:$0xff]   ;;  %v2721_v14 = vld [vmem:[#allocation7 + $0x60] ss:$8 sps:$4 sm:$0xff]  }
  0xd7   : > { %v2751_v13 = vld [vmem:[%s3652_s2 + $0x4] ss:$8 sps:$4 sm:$0xff]   ;;  %v2722_v15 = vld [vmem:[#allocation7 + $0x74] ss:$8 sps:$4 sm:$0xff]   ;;  %v2724_v16 = vld [vmem:[#allocation7 + $0x70] ss:$8 sps:$4 sm:$0xff]  }
  0xd8   : > { %823 = vmatpush1.bf16.msra.mxu0 %v2706_v3  ;;  %852 = vmatprep.mubr.bf16.mxu0 %v2751_v13  ;;  %v2725_v17 = vld [vmem:[#allocation7 + $0x84] ss:$8 sps:$4 sm:$0xff]   ;;  %v2727_v18 = vld [vmem:[#allocation7 + $0x80] ss:$8 sps:$4 sm:$0xff]   ;;  %v2728_v19 = vld [vmem:[#allocation7 + $0x94] ss:$8 sps:$4 sm:$0xff]  }
  0xd9   : > { %824 = vmatprep.subr.bf16.mxu0 %v2707_v4  ;;  %v2773_v20 = vld [vmem:[#allocation8 + $0x4] ss:$8 sps:$4 sm:$0xff]   ;;  %v2775_v21 = vld [vmem:[#allocation8] ss:$8 sps:$4 sm:$0xff]   ;;  %v2730_v22 = vld [vmem:[#allocation7 + $0x90] ss:$8 sps:$4 sm:$0xff]  }
  0xda   : > { %1185 = vmatprep.subr.bf16.mxu1 %v2773_v20  ;;  %v2776_v23 = vld [vmem:[#allocation8 + $0x14] ss:$8 sps:$4 sm:$0xff]   ;;  %v2731_v24 = vld [vmem:[#allocation7 + $0xa4] ss:$8 sps:$4 sm:$0xff]   ;;  %v2778_v25 = vld [vmem:[#allocation8 + $0x10] ss:$8 sps:$4 sm:$0xff]  }
  0xdb   : > { %1186 = vmatpush1.bf16.msra.mxu1 %v2775_v21  ;;  %v2779_v26 = vld [vmem:[#allocation8 + $0x24] ss:$8 sps:$4 sm:$0xff]   ;;  %v2733_v27 = vld [vmem:[#allocation7 + $0xa0] ss:$8 sps:$4 sm:$0xff]   ;;  %v2734_v28 = vld [vmem:[#allocation7 + $0xb4] ss:$8 sps:$4 sm:$0xff]  }
  0xdc   : > { %825 = vmatpush1.bf16.msra.mxu0 %v2709_v5  ;;  %1187 = vmatprep.subr.bf16.mxu1 %v2776_v23  ;;  %v2781_v29 = vld [vmem:[#allocation8 + $0x20] ss:$8 sps:$4 sm:$0xff]   ;;  %v2782_v30 = vld [vmem:[#allocation8 + $0x34] ss:$8 sps:$4 sm:$0xff]   ;;  %v2736_v31 = vld [vmem:[#allocation7 + $0xb0] ss:$8 sps:$4 sm:$0xff]  }
  0xdd   : > { %826 = vmatprep.subr.bf16.mxu0 %v2710_v6  ;;  %v2737_v32 = vld [vmem:[#allocation7 + $0xc4] ss:$8 sps:$4 sm:$0xff]   ;;  %v2784_v33 = vld [vmem:[#allocation8 + $0x30] ss:$8 sps:$4 sm:$0xff]   ;;  %v2739_v35 = vld [vmem:[#allocation7 + $0xc0] ss:$8 sps:$4 sm:$0xff]  }
  0xde   : > { %v2785_v34 = vld [vmem:[#allocation8 + $0x44] ss:$8 sps:$4 sm:$0xff]   ;;  %v2740_v36 = vld [vmem:[#allocation7 + $0xd4] ss:$8 sps:$4 sm:$0xff]   ;;  %v2787_v37 = vld [vmem:[#allocation8 + $0x40] ss:$8 sps:$4 sm:$0xff]  }
  0xdf   : > { %1188 = vmatpush1.bf16.msra.mxu1 %v2778_v25  ;;  %v2788_v38 = vld [vmem:[#allocation8 + $0x54] ss:$8 sps:$4 sm:$0xff]   ;;  %v2742_v39 = vld [vmem:[#allocation7 + $0xd0] ss:$8 sps:$4 sm:$0xff]   ;;  %v2743_v40 = vld [vmem:[#allocation7 + $0xe4] ss:$8 sps:$4 sm:$0xff]  }
  0xe0   : > { %827 = vmatpush1.bf16.msra.mxu0 %v2712_v7  ;;  %1189 = vmatprep.subr.bf16.mxu1 %v2779_v26  ;;  %v2790_v41 = vld [vmem:[#allocation8 + $0x50] ss:$8 sps:$4 sm:$0xff]   ;;  %v2791_v42 = vld [vmem:[#allocation8 + $0x64] ss:$8 sps:$4 sm:$0xff]   ;;  %v2745_v43 = vld [vmem:[#allocation7 + $0xe0] ss:$8 sps:$4 sm:$0xff]  }
  0xe1   : > { %828 = vmatprep.subr.bf16.mxu0 %v2713_v8  ;;  %v2793_v44 = vld [vmem:[#allocation8 + $0x60] ss:$8 sps:$4 sm:$0xff]   ;;  %v2746_v45 = vld [vmem:[#allocation7 + $0xf4] ss:$8 sps:$4 sm:$0xff]   ;;  %v2748_v47 = vld [vmem:[#allocation7 + $0xf0] ss:$8 sps:$4 sm:$0xff]  }
  0xe2   : > { %v2794_v46 = vld [vmem:[#allocation8 + $0x74] ss:$8 sps:$4 sm:$0xff]   ;;  %v2796_v48 = vld [vmem:[#allocation8 + $0x70] ss:$8 sps:$4 sm:$0xff]   ;;  %v2797_v49 = vld [vmem:[#allocation8 + $0x84] ss:$8 sps:$4 sm:$0xff]  }
  0xe3   : > { %1190 = vmatpush1.bf16.msra.mxu1 %v2781_v29  ;;  %v2749_v50 = vld [vmem:[%s3652_s2] ss:$8 sps:$4 sm:$0xff]   ;;  %v2752_v51 = vld [vmem:[%s3652_s2 + $0x14] ss:$8 sps:$4 sm:$0xff]   ;;  %v2802_v54 = vld [vmem:[#allocation8 + $0x90] ss:$8 sps:$4 sm:$0xff]  }
  0xe4   : > { %829 = vmatpush1.bf16.msra.mxu0 %v2715_v9  ;;  %1191 = vmatprep.subr.bf16.mxu1 %v2782_v30  ;;  %v2799_v52 = vld [vmem:[#allocation8 + $0x80] ss:$8 sps:$4 sm:$0xff]   ;;  %v2800_v53 = vld [vmem:[#allocation8 + $0x94] ss:$8 sps:$4 sm:$0xff]   ;;  %v2803_v55 = vld [vmem:[#allocation8 + $0xa4] ss:$8 sps:$4 sm:$0xff]   ;;  %v570_v30 = vlaneseq }
  0xe5   : > { %830 = vmatprep.subr.bf16.mxu0 %v2716_v10  ;;  %v2754_v56 = vld [vmem:[%s3652_s2 + $0x10] ss:$8 sps:$4 sm:$0xff]   ;;  %v2755_v57 = vld [vmem:[%s3652_s2 + $0x24] ss:$8 sps:$4 sm:$0xff]   ;;  %v2805_v58 = vld [vmem:[#allocation8 + $0xa0] ss:$8 sps:$4 sm:$0xff]  }
  0xe6   : > { %v2806_v59 = vld [vmem:[#allocation8 + $0xb4] ss:$8 sps:$4 sm:$0xff]   ;;  %v2808_v60 = vld [vmem:[#allocation8 + $0xb0] ss:$8 sps:$4 sm:$0xff]   ;;  %v2809_v61 = vld [vmem:[#allocation8 + $0xc4] ss:$8 sps:$4 sm:$0xff]  }
  0xe7   : > { %1192 = vmatpush1.bf16.msra.mxu1 %v2784_v33  ;;  %v2757_v62 = vld [vmem:[%s3652_s2 + $0x20] ss:$8 sps:$4 sm:$0xff]   ;;  %v2758_v63 = vld [vmem:[%s3652_s2 + $0x34] ss:$8 sps:$4 sm:$0xff]   ;;  %v2760_v2 = vld [vmem:[%s3652_s2 + $0x30] ss:$8 sps:$4 sm:$0xff]  }
  0xe8   : > { %831 = vmatpush1.bf16.msra.mxu0 %v2718_v11  ;;  %1193 = vmatprep.subr.bf16.mxu1 %v2785_v34  ;;  %v2811_v0 = vld [vmem:[#allocation8 + $0xc0] ss:$8 sps:$4 sm:$0xff]   ;;  %v2812_v1 = vld [vmem:[#allocation8 + $0xd4] ss:$8 sps:$4 sm:$0xff]   ;;  %v2761_v3 = vld [vmem:[%s3652_s2 + $0x44] ss:$8 sps:$4 sm:$0xff]  }
  0xe9   : > { %832 = vmatprep.subr.bf16.mxu0 %v2719_v12  ;;  %v2763_v4 = vld [vmem:[%s3652_s2 + $0x40] ss:$8 sps:$4 sm:$0xff]   ;;  %v2764_v5 = vld [vmem:[%s3652_s2 + $0x54] ss:$8 sps:$4 sm:$0xff]   ;;  %v2766_v6 = vld [vmem:[%s3652_s2 + $0x50] ss:$8 sps:$4 sm:$0xff]  }
  0xea   : > { %v2767_v7 = vld [vmem:[%s3652_s2 + $0x64] ss:$8 sps:$4 sm:$0xff]   ;;  %v2769_v8 = vld [vmem:[%s3652_s2 + $0x60] ss:$8 sps:$4 sm:$0xff]   ;;  %v2770_v9 = vld [vmem:[%s3652_s2 + $0x74] ss:$8 sps:$4 sm:$0xff]  }
  0xeb   : > { %1194 = vmatpush1.bf16.msra.mxu1 %v2787_v37  ;;  %v2772_v10 = vld [vmem:[%s3652_s2 + $0x70] ss:$8 sps:$4 sm:$0xff]   ;;  %v2815_v12 = vld [vmem:[#allocation8 + $0xe4] ss:$8 sps:$4 sm:$0xff]   ;;  %v2817_v13 = vld [vmem:[#allocation8 + $0xe0] ss:$8 sps:$4 sm:$0xff]  }
  0xec   : > { %833 = vmatpush1.bf16.msra.mxu0 %v2721_v14  ;;  %1195 = vmatprep.subr.bf16.mxu1 %v2788_v38  ;;  %v2814_v11 = vld [vmem:[#allocation8 + $0xd0] ss:$8 sps:$4 sm:$0xff]   ;;  %v2818_v14 = vld [vmem:[#allocation8 + $0xf4] ss:$8 sps:$4 sm:$0xff]   ;;  %v2829_v20 = vld [vmem:[#allocation10 + $0x24] ss:$8 sps:$4 sm:$0xff]  }
  0xed   : > { %834 = vmatprep.subr.bf16.mxu0 %v2722_v15  ;;  %v2820_v15 = vld [vmem:[#allocation8 + $0xf0] ss:$8 sps:$4 sm:$0xff]   ;;  %v2827_v21 = vld [vmem:[#allocation10 + $0x20] ss:$8 sps:$4 sm:$0xff]   ;;  %v2838_v26 = vld [vmem:[#allocation10 + $0x54] ss:$8 sps:$4 sm:$0xff]  }
  0xee   : > { %v2830_v23 = vld [vmem:[#allocation10 + $0x30] ss:$8 sps:$4 sm:$0xff]   ;;  %v2833_v25 = vld [vmem:[#allocation10 + $0x40] ss:$8 sps:$4 sm:$0xff]   ;;  %s2420_s10 = sshll.u32 %s3648_s28, 8  ;;  %s2596_s27 = sshll.u32 %s3403_s21, 12 }
  0xef   : > { %1196 = vmatpush1.bf16.msra.mxu1 %v2790_v41  ;;  %v2839_v29 = vld [vmem:[#allocation10 + $0x60] ss:$8 sps:$4 sm:$0xff]   ;;  %s3754_s4 = scalar_lea.vmem [#allocation14], %s2420_s10  ;;  %s4103_s11 = sld [smem:[#allocation30_spill]] }
  0xf0   : > { %835 = vmatpush1.bf16.msra.mxu0 %v2724_v16  ;;  %1197 = vmatprep.subr.bf16.mxu1 %v2791_v42  ;;  %v2821_v16 = vld [vmem:[#allocation10] ss:$8 sps:$4 sm:$0xff]   ;;  %s2233_s2 = sshll.u32 %s3754_s4, 4  ;;  %s2202_s15 = scalar_lea.sflag [#allocation15], %s3648_s28  ;;  %s3890_s2 = int_to_ptr.vmem [resolvable:$true] %s2233_s2 }
  0xf1   : > { %836 = vmatprep.subr.bf16.mxu0 %v2725_v17  ;;  %v2823_v17 = vld [vmem:[#allocation10 + $0x4] ss:$8 sps:$4 sm:$0xff]   ;;  %v568_v33 = vld [vmem:[%s4054_s3] sm:$0x3]  ;;  %s3193_s25 = scalar_lea.vmem %s3890_s2, 4096 }
  0xf2   : > { %p3194_p0 = scmp.ne.s32.totalorder %s3890_s2, %s3193_s25 }
  0xf3   : > { %1198 = vmatpush1.bf16.msra.mxu1 %v2793_v44 }
  0xf4   : > { %837 = vmatpush1.bf16.msra.mxu0 %v2727_v18  ;;  %1199 = vmatprep.subr.bf16.mxu1 %v2794_v46  ;;  %v2826_v18 = vld [vmem:[#allocation10 + $0x14] ss:$8 sps:$4 sm:$0xff]   ;;  %p3195_p4 = pnand %p3194_p0, %p3553_p10 }
  0xf5   : > { %838 = vmatprep.subr.bf16.mxu0 %v2728_v19  ;;  %v2824_v19 = vld [vmem:[#allocation10 + $0x10] ss:$8 sps:$4 sm:$0xff]   ;;  %s3887_s26 = scalar_lea.hbm %s4103_s11, %s2596_s27 }
  0xf6   : > { %p3196_p6 = pneg %p3195_p4 }
  0xf7   : > { %1200 = vmatpush1.bf16.msra.mxu1 %v2796_v48 }
  0xf8   : > { %839 = vmatpush1.bf16.msra.mxu0 %v2730_v22  ;;  %1201 = vmatprep.subr.bf16.mxu1 %v2797_v49  ;;  %v2832_v22 = vld [vmem:[#allocation10 + $0x34] ss:$8 sps:$4 sm:$0xff]  }
  0xf9   : > { %840 = vmatprep.subr.bf16.mxu0 %v2731_v24  ;;  %v2835_v24 = vld [vmem:[#allocation10 + $0x44] ss:$8 sps:$4 sm:$0xff]  }
  0xfb   : > { %1202 = vmatpush1.bf16.msra.mxu1 %v2799_v52 }
  0xfc   : > { %841 = vmatpush1.bf16.msra.mxu0 %v2733_v27  ;;  %1203 = vmatprep.subr.bf16.mxu1 %v2800_v53  ;;  %v2836_v27 = vld [vmem:[#allocation10 + $0x50] ss:$8 sps:$4 sm:$0xff]  }
  0xfd   : > { %842 = vmatprep.subr.bf16.mxu0 %v2734_v28  ;;  %v2841_v28 = vld [vmem:[#allocation10 + $0x64] ss:$8 sps:$4 sm:$0xff]  }
  0xff   : > { %1204 = vmatpush1.bf16.msra.mxu1 %v2802_v54 }
 0x100   : > { %843 = vmatpush1.bf16.msra.mxu0 %v2736_v31  ;;  %1205 = vmatprep.subr.bf16.mxu1 %v2803_v55  ;;  %v571_v31 = vshrl.u32 %v570_v30, 7 }
 0x101   : > { %844 = vmatprep.subr.bf16.mxu0 %v2737_v32 }
 0x102   : > { %v3693_v32 = vsub.s32 0, %v571_v31  ;;  %v3698_v34 = vsub.s32 1, %v571_v31 }
 0x103   : > { %1206 = vmatpush1.bf16.msra.mxu1 %v2805_v58 }
 0x104   : > { %845 = vmatpush1.bf16.msra.mxu0 %v2739_v35  ;;  %1207 = vmatprep.subr.bf16.mxu1 %v2806_v59  ;;  %v3701_v35 = vrot.slane %v568_v33, %v3693_v32 }
 0x105   : > { %846 = vmatprep.subr.bf16.mxu0 %v2740_v36  ;;  %v3704_v36 = vrot.slane %v568_v33, %v3698_v34 }
 0x107   : > { %1208 = vmatpush1.bf16.msra.mxu1 %v2808_v60 }
 0x108   : > { %847 = vmatpush1.bf16.msra.mxu0 %v2742_v39  ;;  %1209 = vmatprep.subr.bf16.mxu1 %v2809_v61 }
 0x109   : > { %848 = vmatprep.subr.bf16.mxu0 %v2743_v40 }
 0x10b   : > { %1210 = vmatpush1.bf16.msra.mxu1 %v2811_v0 }
 0x10c   : > { %849 = vmatpush1.bf16.msra.mxu0 %v2745_v43  ;;  %1211 = vmatprep.subr.bf16.mxu1 %v2812_v1 }
 0x10d   : > { %850 = vmatprep.subr.bf16.mxu0 %v2746_v45 }
 0x10f   : > { %1212 = vmatpush1.bf16.msra.mxu1 %v2814_v11 }
 0x110   : > { %851 = vmatpush1.bf16.msra.mxu0 %v2748_v47  ;;  %1213 = vmatprep.subr.bf16.mxu1 %v2815_v12 }
 0x111   : > { %1462 = vmatprep.subr.bf16.mxu0 %v2823_v17 }
 0x113   : > { %853 = vmatmul.mubr.bf16.vlgmr.msra.gmra.mrb[0].mxu0 %v2749_v50  ;;  %1214 = vmatpush1.bf16.msra.mxu1 %v2817_v13 }
 0x114   : > { %862 = vmatprep.mubr.bf16.mxu0 %v2752_v51  ;;  %1215 = vmatprep.subr.bf16.mxu1 %v2818_v14 }
 0x115   : > { %1463 = vmatpush1.bf16.msra.mxu0 %v2821_v16 }
 0x116   : > { %1464 = vmatprep.subr.bf16.mxu0 %v2826_v18 }
 0x117   : > { %1216 = vmatpush1.bf16.msra.mxu1 %v2820_v15 }
 0x119   : > { %1465 = vmatpush1.bf16.msra.mxu0 %v2824_v19 }
 0x11a   : > { %1466 = vmatprep.subr.bf16.mxu0 %v2829_v20 }
 0x11b   : > { %863 = vmatmul.mubr.bf16.gmra.mrb[4].mxu0 %v2754_v56 }
 0x11c   : > { %872 = vmatprep.mubr.bf16.mxu0 %v2755_v57 }
 0x11d   : > { %1467 = vmatpush1.bf16.msra.mxu0 %v2827_v21 }
 0x11e   : > { %1468 = vmatprep.subr.bf16.mxu0 %v2832_v22 }
 0x121   : > { %1469 = vmatpush1.bf16.msra.mxu0 %v2830_v23 }
 0x122   : > { %1470 = vmatprep.subr.bf16.mxu0 %v2835_v24 }
 0x123   : > { %873 = vmatmul.mubr.bf16.gmra.mrb[8].mxu0 %v2757_v62 }
 0x124   : > { %882 = vmatprep.mubr.bf16.mxu0 %v2758_v63 }
 0x125   : > { %1471 = vmatpush1.bf16.msra.mxu0 %v2833_v25 }
 0x126   : > { %1472 = vmatprep.subr.bf16.mxu0 %v2838_v26 }
 0x129   : > { %1473 = vmatpush1.bf16.msra.mxu0 %v2836_v27 }
 0x12a   : > { %1474 = vmatprep.subr.bf16.mxu0 %v2841_v28 }
 0x12b   : > { %883 = vmatmul.mubr.bf16.gmra.mrb[12].mxu0 %v2760_v2 }
 0x12c   : > { %892 = vmatprep.mubr.bf16.mxu0 %v2761_v3 }
 0x12d   : > { %1475 = vmatpush1.bf16.msra.mxu0 %v2839_v29 }
 0x133   : > { %893 = vmatmul.mubr.bf16.gmra.mrb[16].mxu0 %v2763_v4 }
 0x134   : > { %902 = vmatprep.mubr.bf16.mxu0 %v2764_v5 }
 0x13b   : > { %903 = vmatmul.mubr.bf16.gmra.mrb[20].mxu0 %v2766_v6 }
 0x13c   : > { %912 = vmatprep.mubr.bf16.mxu0 %v2767_v7 }
 0x143   : > { %913 = vmatmul.mubr.bf16.gmra.mrb[24].mxu0 %v2769_v8 }
 0x144   : > { %922 = vmatprep.mubr.bf16.mxu0 %v2770_v9 }
 0x14b   : > { %923 = vmatmul.mubr.bf16.gmra.mrb[28].mxu0 %v2772_v10 }
 0x1e6   : > { %v854_v37 = vpop.f32.mrb[0].mxu0 }
 0x1e7   : > { %v855_v38 = vadd.f32 %v854_v37, %v3701_v35  ;;  %v856_v39 = vpop.f32.mrb[1].mxu0 }
 0x1e8   : > { %v857_v40 = vadd.f32 %v856_v39, %v3704_v36  ;;  %v858_v41 = vpop.f32.mrb[2].mxu0 }
 0x1e9   : > { %v859_v42 = vadd.f32 %v858_v41, %v3701_v35  ;;  %v860_v43 = vpop.f32.mrb[3].mxu0  ;;  %v933_v45 = vmax.f32 %v855_v38, 0.0 }
 0x1ea   : > { %v861_v44 = vadd.f32 %v860_v43, %v3704_v36  ;;  %v934_v47 = vmax.f32 %v857_v40, 0.0 }
 0x1eb   : > { %v935_v46 = vmax.f32 %v859_v42, 0.0 }
 0x1ec   : > { %v936_v48 = vmax.f32 %v861_v44, 0.0 }
 0x1ed   : > { %v965_v49 = vpack.c.bf16 %v935_v46, %v933_v45 }
 0x1ee   : > { %v864_v50 = vpop.f32.mrb[4].mxu0  ;;  %v966_v51 = vpack.c.bf16 %v936_v48, %v934_v47 }
 0x1ef   : > { %v865_v52 = vadd.f32 %v864_v50, %v3701_v35  ;;  %v866_v53 = vpop.f32.mrb[5].mxu0 }
 0x1f0   : > { %v867_v54 = vadd.f32 %v866_v53, %v3704_v36  ;;  %v868_v55 = vpop.f32.mrb[6].mxu0  ;;  %1217 = vmatprep.mubr.bf16.mxu1 %v966_v51 }
 0x1f1   : > { %v869_v56 = vadd.f32 %v868_v55, %v3701_v35  ;;  %v870_v57 = vpop.f32.mrb[7].mxu0  ;;  %1218 = vmatmul.mubr.bf16.vlgmr.msra.gmra.mrb[0].mxu1 %v965_v49  ;;  %v937_v59 = vmax.f32 %v865_v52, 0.0 }
 0x1f2   : > { %v871_v58 = vadd.f32 %v870_v57, %v3704_v36  ;;  %v938_v61 = vmax.f32 %v867_v54, 0.0 }
 0x1f3   : > { %v939_v60 = vmax.f32 %v869_v56, 0.0 }
 0x1f4   : > { %v940_v62 = vmax.f32 %v871_v58, 0.0 }
 0x1f5   : > { %v967_v63 = vpack.c.bf16 %v939_v60, %v937_v59 }
 0x1f6   : > { %v968_v0 = vpack.c.bf16 %v940_v62, %v938_v61  ;;  %v874_v1 = vpop.f32.mrb[8].mxu0 }
 0x1f7   : > { %v875_v2 = vadd.f32 %v874_v1, %v3701_v35  ;;  %v876_v3 = vpop.f32.mrb[9].mxu0 }
 0x1f8   : > { %v877_v4 = vadd.f32 %v876_v3, %v3704_v36  ;;  %v878_v5 = vpop.f32.mrb[10].mxu0  ;;  %1227 = vmatprep.mubr.bf16.mxu1 %v968_v0 }
 0x1f9   : > { %v879_v6 = vadd.f32 %v878_v5, %v3701_v35  ;;  %v880_v7 = vpop.f32.mrb[11].mxu0  ;;  %1228 = vmatmul.mubr.bf16.gmra.mrb[4].mxu1 %v967_v63  ;;  %v941_v9 = vmax.f32 %v875_v2, 0.0 }
 0x1fa   : > { %v881_v8 = vadd.f32 %v880_v7, %v3704_v36  ;;  %v942_v11 = vmax.f32 %v877_v4, 0.0 }
 0x1fb   : > { %v943_v10 = vmax.f32 %v879_v6, 0.0 }
 0x1fc   : > { %v944_v12 = vmax.f32 %v881_v8, 0.0 }
 0x1fd   : > { %v969_v13 = vpack.c.bf16 %v943_v10, %v941_v9 }
 0x1fe   : > { %v970_v14 = vpack.c.bf16 %v944_v12, %v942_v11  ;;  %v884_v15 = vpop.f32.mrb[12].mxu0 }
 0x1ff   : > { %v885_v16 = vadd.f32 %v884_v15, %v3701_v35  ;;  %v886_v17 = vpop.f32.mrb[13].mxu0 }
 0x200   : > { %v887_v18 = vadd.f32 %v886_v17, %v3704_v36  ;;  %v888_v19 = vpop.f32.mrb[14].mxu0  ;;  %1237 = vmatprep.mubr.bf16.mxu1 %v970_v14 }
 0x201   : > { %v889_v20 = vadd.f32 %v888_v19, %v3701_v35  ;;  %v890_v21 = vpop.f32.mrb[15].mxu0  ;;  %1238 = vmatmul.mubr.bf16.gmra.mrb[8].mxu1 %v969_v13  ;;  %v945_v23 = vmax.f32 %v885_v16, 0.0 }
 0x202   : > { %v891_v22 = vadd.f32 %v890_v21, %v3704_v36  ;;  %v946_v25 = vmax.f32 %v887_v18, 0.0 }
 0x203   : > { %v947_v24 = vmax.f32 %v889_v20, 0.0 }
 0x204   : > { %v948_v26 = vmax.f32 %v891_v22, 0.0 }
 0x205   : > { %v971_v27 = vpack.c.bf16 %v947_v24, %v945_v23 }
 0x206   : > { %v972_v28 = vpack.c.bf16 %v948_v26, %v946_v25  ;;  %v894_v29 = vpop.f32.mrb[16].mxu0  ;;  %v2844_v25 = vld [vmem:[#allocation10 + $0x74] ss:$8 sps:$4 sm:$0xff]   ;;  %v2842_v26 = vld [vmem:[#allocation10 + $0x70] ss:$8 sps:$4 sm:$0xff]  }
 0x207   : > { %v895_v30 = vadd.f32 %v894_v29, %v3701_v35  ;;  %v896_v31 = vpop.f32.mrb[17].mxu0  ;;  %1476 = vmatprep.subr.bf16.mxu0 %v2844_v25  ;;  %v2850_v29 = vld [vmem:[#allocation11 + $0x14] ss:$8 sps:$4 sm:$0xff]  }
 0x208   : > { %v897_v33 = vadd.f32 %v896_v31, %v3704_v36  ;;  %v898_v37 = vpop.f32.mrb[18].mxu0  ;;  %1247 = vmatprep.mubr.bf16.mxu1 %v972_v28  ;;  %1477 = vmatpush1.bf16.msra.mxu0 %v2842_v26  ;;  %v2847_v28 = vld [vmem:[#allocation11 + $0x4] ss:$8 sps:$4 sm:$0xff]   ;;  %v2851_v31 = vld [vmem:[#allocation11 + $0x20] ss:$8 sps:$4 sm:$0xff]  }
 0x209   : > { %v899_v38 = vadd.f32 %v898_v37, %v3701_v35  ;;  %v900_v39 = vpop.f32.mrb[19].mxu0  ;;  %1248 = vmatmul.mubr.bf16.gmra.mrb[12].mxu1 %v971_v27  ;;  %v949_v41 = vmax.f32 %v895_v30, 0.0  ;;  %v3317_v27 = vmov 0   ;;  %1827 = vmatprep.subr.bf16.mxu1 %v2847_v28  ;;  %v2853_v30 = vld [vmem:[#allocation11 + $0x24] ss:$8 sps:$4 sm:$0xff]  }
 0x20a   : > { %v901_v40 = vadd.f32 %v900_v39, %v3704_v36  ;;  %v950_v43 = vmax.f32 %v897_v33, 0.0  ;;  %1494 = vmatprep.mubr.bf16.mxu0 %v3317_v27  ;;  %v2856_v33 = vld [vmem:[#allocation11 + $0x34] ss:$8 sps:$4 sm:$0xff]   ;;  %v2854_v37 = vld [vmem:[#allocation11 + $0x30] ss:$8 sps:$4 sm:$0xff]  }
 0x20b   : > { %v951_v42 = vmax.f32 %v899_v38, 0.0  ;;  %v2859_v38 = vld [vmem:[#allocation11 + $0x44] ss:$8 sps:$4 sm:$0xff]   ;;  %v2857_v39 = vld [vmem:[#allocation11 + $0x40] ss:$8 sps:$4 sm:$0xff]  }
 0x20c   : > { %v952_v44 = vmax.f32 %v901_v40, 0.0  ;;  %v2862_v40 = vld [vmem:[#allocation11 + $0x54] ss:$8 sps:$4 sm:$0xff]  }
 0x20d   : > { %v973_v45 = vpack.c.bf16 %v951_v42, %v949_v41  ;;  %v2860_v41 = vld [vmem:[#allocation11 + $0x50] ss:$8 sps:$4 sm:$0xff]   ;;  %v2865_v42 = vld [vmem:[#allocation11 + $0x64] ss:$8 sps:$4 sm:$0xff]  }
 0x20e   : > { %v974_v46 = vpack.c.bf16 %v952_v44, %v950_v43  ;;  %v904_v47 = vpop.f32.mrb[20].mxu0  ;;  %v2863_v43 = vld [vmem:[#allocation11 + $0x60] ss:$8 sps:$4 sm:$0xff]   ;;  %v2868_v44 = vld [vmem:[#allocation11 + $0x74] ss:$8 sps:$4 sm:$0xff]  }
 0x20f   : > { %v905_v48 = vadd.f32 %v904_v47, %v3701_v35  ;;  %v906_v49 = vpop.f32.mrb[21].mxu0  ;;  %v2869_v47 = vld [vmem:[#allocation11 + $0x80] ss:$8 sps:$4 sm:$0xff]  }
 0x210   : > { %v907_v50 = vadd.f32 %v906_v49, %v3704_v36  ;;  %v908_v51 = vpop.f32.mrb[22].mxu0  ;;  %1257 = vmatprep.mubr.bf16.mxu1 %v974_v46  ;;  %v2871_v46 = vld [vmem:[#allocation11 + $0x84] ss:$8 sps:$4 sm:$0xff]   ;;  %v2872_v49 = vld [vmem:[#allocation11 + $0x90] ss:$8 sps:$4 sm:$0xff]  }
 0x211   : > { %v909_v52 = vadd.f32 %v908_v51, %v3701_v35  ;;  %v910_v53 = vpop.f32.mrb[23].mxu0  ;;  %1258 = vmatmul.mubr.bf16.gmra.mrb[16].mxu1 %v973_v45  ;;  %v953_v55 = vmax.f32 %v905_v48, 0.0  ;;  %v2866_v45 = vld [vmem:[#allocation11 + $0x70] ss:$8 sps:$4 sm:$0xff]   ;;  %v2874_v48 = vld [vmem:[#allocation11 + $0x94] ss:$8 sps:$4 sm:$0xff]  }
 0x212   : > { %v911_v54 = vadd.f32 %v910_v53, %v3704_v36  ;;  %v954_v57 = vmax.f32 %v907_v50, 0.0  ;;  %v2877_v50 = vld [vmem:[#allocation11 + $0xa4] ss:$8 sps:$4 sm:$0xff]   ;;  %v2875_v51 = vld [vmem:[#allocation11 + $0xa0] ss:$8 sps:$4 sm:$0xff]  }
 0x213   : > { %v955_v56 = vmax.f32 %v909_v52, 0.0  ;;  %v2880_v52 = vld [vmem:[#allocation11 + $0xb4] ss:$8 sps:$4 sm:$0xff]   ;;  %v2878_v53 = vld [vmem:[#allocation11 + $0xb0] ss:$8 sps:$4 sm:$0xff]  }
 0x214   : > { %v956_v58 = vmax.f32 %v911_v54, 0.0  ;;  %v2883_v54 = vld [vmem:[#allocation11 + $0xc4] ss:$8 sps:$4 sm:$0xff]  }
 0x215   : > { %v975_v59 = vpack.c.bf16 %v955_v56, %v953_v55  ;;  %v2881_v55 = vld [vmem:[#allocation11 + $0xc0] ss:$8 sps:$4 sm:$0xff]   ;;  %v2886_v56 = vld [vmem:[#allocation11 + $0xd4] ss:$8 sps:$4 sm:$0xff]  }
 0x216   : > { %v976_v60 = vpack.c.bf16 %v956_v58, %v954_v57  ;;  %v914_v61 = vpop.f32.mrb[24].mxu0  ;;  %v2884_v57 = vld [vmem:[#allocation11 + $0xd0] ss:$8 sps:$4 sm:$0xff]   ;;  %v1013_v58 = vld [vmem:[%s4056_s5] sm:$0x3] }
 0x217   : > { %v915_v62 = vadd.f32 %v914_v61, %v3701_v35  ;;  %v916_v63 = vpop.f32.mrb[25].mxu0 }
 0x218   : > { %v917_v0 = vadd.f32 %v916_v63, %v3704_v36  ;;  %v918_v1 = vpop.f32.mrb[26].mxu0  ;;  %1267 = vmatprep.mubr.bf16.mxu1 %v976_v60  ;;  %v3747_v60 = vrot.slane %v1013_v58, %v3698_v34 }
 0x219   : > { %v919_v2 = vadd.f32 %v918_v1, %v3701_v35  ;;  %v920_v3 = vpop.f32.mrb[27].mxu0  ;;  %1268 = vmatmul.mubr.bf16.gmra.mrb[20].mxu1 %v975_v59  ;;  %v957_v5 = vmax.f32 %v915_v62, 0.0  ;;  %v3744_v59 = vrot.slane %v1013_v58, %v3693_v32 }
 0x21a   : > { %v921_v4 = vadd.f32 %v920_v3, %v3704_v36  ;;  %v958_v7 = vmax.f32 %v917_v0, 0.0  ;;  %v1298_v0 = vld [vmem:[%s3659_s9] sm:$0xff] }
 0x21b   : > { %v959_v6 = vmax.f32 %v919_v2, 0.0 }
 0x21c   : > { %v960_v8 = vmax.f32 %v921_v4, 0.0 }
 0x21d   : > { %v977_v9 = vpack.c.bf16 %v959_v6, %v957_v5  ;;  %v1299_v5 = vld [vmem:[%s3659_s9 + $0x8] sm:$0xff] }
 0x21e   : > { %v978_v10 = vpack.c.bf16 %v960_v8, %v958_v7  ;;  %v924_v11 = vpop.f32.mrb[28].mxu0 }
 0x21f   : > { %v925_v12 = vadd.f32 %v924_v11, %v3701_v35  ;;  %v926_v13 = vpop.f32.mrb[29].mxu0 }
 0x220   : > { %v927_v14 = vadd.f32 %v926_v13, %v3704_v36  ;;  %v928_v15 = vpop.f32.mrb[30].mxu0  ;;  %1277 = vmatprep.mubr.bf16.mxu1 %v978_v10 }
 0x221   : > { %v929_v16 = vadd.f32 %v928_v15, %v3701_v35  ;;  %v930_v17 = vpop.f32.mrb[31].mxu0  ;;  %1278 = vmatmul.mubr.bf16.gmra.mrb[24].mxu1 %v977_v9  ;;  %v961_v19 = vmax.f32 %v925_v12, 0.0  ;;  %v2845_v35 = vld [vmem:[#allocation11] ss:$8 sps:$4 sm:$0xff]  }
 0x222   : > { %v931_v18 = vadd.f32 %v930_v17, %v3704_v36  ;;  %v962_v21 = vmax.f32 %v927_v14, 0.0  ;;  %1828 = vmatpush1.bf16.msra.mxu1 %v2845_v35  ;;  %v2848_v36 = vld [vmem:[#allocation11 + $0x10] ss:$8 sps:$4 sm:$0xff]  }
 0x223   : > { %v963_v20 = vmax.f32 %v929_v16, 0.0  ;;  %1829 = vmatprep.subr.bf16.mxu1 %v2850_v29  ;;  %v1300_v14 = vld [vmem:[%s3659_s9 + $0x10] sm:$0xff]  ;;  %v1302_v29 = vld [vmem:[%s3659_s9 + $0x20] sm:$0xff] }
 0x224   : > { %v964_v22 = vmax.f32 %v931_v18, 0.0 }
 0x225   : > { %v979_v23 = vpack.c.bf16 %v963_v20, %v961_v19  ;;  %v1301_v20 = vld [vmem:[%s3659_s9 + $0x18] sm:$0xff] }
 0x226   : > { %v980_v24 = vpack.c.bf16 %v964_v22, %v962_v21  ;;  %1830 = vmatpush1.bf16.msra.mxu1 %v2848_v36 }
 0x227   : > { %1831 = vmatprep.subr.bf16.mxu1 %v2853_v30 }
 0x228   : > { %1287 = vmatprep.mubr.bf16.mxu1 %v980_v24 }
 0x229   : > { %1288 = vmatmul.mubr.bf16.gmra.mrb[28].mxu1 %v979_v23 }
 0x22a   : > { %1832 = vmatpush1.bf16.msra.mxu1 %v2851_v31 }
 0x22b   : > { %1833 = vmatprep.subr.bf16.mxu1 %v2856_v33 }
 0x22e   : > { %1834 = vmatpush1.bf16.msra.mxu1 %v2854_v37 }
 0x22f   : > { %1835 = vmatprep.subr.bf16.mxu1 %v2859_v38  ;;  %v1303_v38 = vld [vmem:[%s3659_s9 + $0x28] sm:$0xff] }
 0x232   : > { %1836 = vmatpush1.bf16.msra.mxu1 %v2857_v39 }
 0x233   : > { %1837 = vmatprep.subr.bf16.mxu1 %v2862_v40 }
 0x236   : > { %1838 = vmatpush1.bf16.msra.mxu1 %v2860_v41 }
 0x237   : > { %1839 = vmatprep.subr.bf16.mxu1 %v2865_v42 }
 0x23a   : > { %1840 = vmatpush1.bf16.msra.mxu1 %v2863_v43 }
 0x23b   : > { %1841 = vmatprep.subr.bf16.mxu1 %v2868_v44 }
 0x23e   : > { %1842 = vmatpush1.bf16.msra.mxu1 %v2866_v45 }
 0x23f   : > { %1843 = vmatprep.subr.bf16.mxu1 %v2871_v46 }
 0x242   : > { %1844 = vmatpush1.bf16.msra.mxu1 %v2869_v47  ;;  %v1304_v47 = vld [vmem:[%s3659_s9 + $0x30] sm:$0xff] }
 0x243   : > { %1845 = vmatprep.subr.bf16.mxu1 %v2874_v48 }
 0x246   : > { %1846 = vmatpush1.bf16.msra.mxu1 %v2872_v49 }
 0x247   : > { %1847 = vmatprep.subr.bf16.mxu1 %v2877_v50 }
 0x24a   : > { %1848 = vmatpush1.bf16.msra.mxu1 %v2875_v51 }
 0x24b   : > { %1849 = vmatprep.subr.bf16.mxu1 %v2880_v52 }
 0x24e   : > { %1850 = vmatpush1.bf16.msra.mxu1 %v2878_v53  ;;  %v1305_v53 = vld [vmem:[%s3659_s9 + $0x38] sm:$0xff] }
 0x24f   : > { %1851 = vmatprep.subr.bf16.mxu1 %v2883_v54 }
 0x252   : > { %1852 = vmatpush1.bf16.msra.mxu1 %v2881_v55 }
 0x253   : > { %1853 = vmatprep.subr.bf16.mxu1 %v2886_v56 }
 0x256   : > { %1854 = vmatpush1.bf16.msra.mxu1 %v2884_v57 }
 0x2c4   : > { %v1219_v61 = vpop.f32.mrb[0].mxu1 }
 0x2c5   : > { %v1220_v62 = vadd.f32 %v1219_v61, %v3744_v59  ;;  %v1221_v63 = vpop.f32.mrb[1].mxu1 }
 0x2c6   : > { %v1222_v1 = vadd.f32 %v1221_v63, %v3747_v60  ;;  %v1223_v2 = vpop.f32.mrb[2].mxu1 }
 0x2c7   : > { %2164 = vst [vmem:[%s3754_s4] sm:$0xff] %v1220_v62  ;;  %v1224_v3 = vadd.f32 %v1223_v2, %v3744_v59  ;;  %v1225_v4 = vpop.f32.mrb[3].mxu1 }
 0x2c8   : > { %v1314_v6 = vmul.f32 %v1298_v0, %v1222_v1  ;;  %2165 = vst [vmem:[%s3754_s4 + $0x8] sm:$0xff] %v1222_v1  ;;  %v1226_v7 = vadd.f32 %v1225_v4, %v3747_v60  ;;  %v1306_v0 = vld [vmem:[%s3659_s9 + $0x40] sm:$0xff] }
 0x2c9   : > { %2166 = vst [vmem:[%s3754_s4 + $0x10] sm:$0xff] %v1224_v3 }
 0x2ca   : > { %v1330_v8 = vadd.f32 %v1314_v6, %v1220_v62  ;;  %v1315_v9 = vmul.f32 %v1299_v5, %v1226_v7  ;;  %2167 = vst [vmem:[%s3754_s4 + $0x18] sm:$0xff] %v1226_v7  ;;  %v1307_v6 = vld [vmem:[%s3659_s9 + $0x48] sm:$0xff] }
 0x2cc   : > { %v1331_v10 = vadd.f32 %v1315_v9, %v1224_v3  ;;  %v1229_v11 = vpop.f32.mrb[4].mxu1 }
 0x2cd   : > { %v1230_v12 = vadd.f32 %v1229_v11, %v3744_v59  ;;  %v1231_v13 = vpop.f32.mrb[5].mxu1 }
 0x2ce   : > { %v1346_v15 = vpack.c.bf16 %v1331_v10, %v1330_v8  ;;  %v1232_v16 = vadd.f32 %v1231_v13, %v3747_v60  ;;  %v1233_v17 = vpop.f32.mrb[6].mxu1 }
 0x2cf   : > { %2168 = vst [vmem:[%s3754_s4 + $0x20] sm:$0xff] %v1230_v12  ;;  %v1234_v18 = vadd.f32 %v1233_v17, %v3744_v59  ;;  %v1235_v19 = vpop.f32.mrb[7].mxu1 }
 0x2d0   : > { %v1316_v21 = vmul.f32 %v1300_v14, %v1232_v16  ;;  %2169 = vst [vmem:[%s3754_s4 + $0x28] sm:$0xff] %v1232_v16  ;;  %v1236_v22 = vadd.f32 %v1235_v19, %v3747_v60  ;;  %1495 = vmatmul.mubr.bf16.vlgmr.msra.gmra.mrb[32].mxu0 %v1346_v15  ;;  %v1308_v15 = vld [vmem:[%s3659_s9 + $0x50] sm:$0xff] }
 0x2d1   : > { %2170 = vst [vmem:[%s3754_s4 + $0x30] sm:$0xff] %v1234_v18  ;;  %1504 = vmatprep.mubr.bf16.mxu0 %v3317_v27 }
 0x2d2   : > { %v1332_v23 = vadd.f32 %v1316_v21, %v1230_v12  ;;  %v1317_v24 = vmul.f32 %v1301_v20, %v1236_v22  ;;  %2171 = vst [vmem:[%s3754_s4 + $0x38] sm:$0xff] %v1236_v22  ;;  %v1309_v21 = vld [vmem:[%s3659_s9 + $0x58] sm:$0xff] }
 0x2d4   : > { %v1333_v25 = vadd.f32 %v1317_v24, %v1234_v18  ;;  %v1239_v26 = vpop.f32.mrb[8].mxu1 }
 0x2d5   : > { %v1240_v35 = vadd.f32 %v1239_v26, %v3744_v59  ;;  %v1241_v28 = vpop.f32.mrb[9].mxu1 }
 0x2d6   : > { %v1242_v36 = vadd.f32 %v1241_v28, %v3747_v60  ;;  %v1243_v30 = vpop.f32.mrb[10].mxu1  ;;  %v1347_v31 = vpack.c.bf16 %v1333_v25, %v1332_v23 }
 0x2d7   : > { %2172 = vst [vmem:[%s3754_s4 + $0x40] sm:$0xff] %v1240_v35  ;;  %v1244_v33 = vadd.f32 %v1243_v30, %v3744_v59  ;;  %v1245_v37 = vpop.f32.mrb[11].mxu1 }
 0x2d8   : > { %v1318_v39 = vmul.f32 %v1302_v29, %v1242_v36  ;;  %2173 = vst [vmem:[%s3754_s4 + $0x48] sm:$0xff] %v1242_v36  ;;  %v1246_v40 = vadd.f32 %v1245_v37, %v3747_v60  ;;  %1505 = vmatmul.mubr.bf16.gmra.mrb[36].mxu0 %v1347_v31  ;;  %v1310_v36 = vld [vmem:[%s3659_s9 + $0x60] sm:$0xff] }
 0x2d9   : > { %2174 = vst [vmem:[%s3754_s4 + $0x50] sm:$0xff] %v1244_v33  ;;  %1514 = vmatprep.mubr.bf16.mxu0 %v3317_v27 }
 0x2da   : > { %v1334_v41 = vadd.f32 %v1318_v39, %v1240_v35  ;;  %v1319_v42 = vmul.f32 %v1303_v38, %v1246_v40  ;;  %2175 = vst [vmem:[%s3754_s4 + $0x58] sm:$0xff] %v1246_v40  ;;  %v1311_v39 = vld [vmem:[%s3659_s9 + $0x68] sm:$0xff] }
 0x2dc   : > { %v1335_v43 = vadd.f32 %v1319_v42, %v1244_v33  ;;  %v1249_v44 = vpop.f32.mrb[12].mxu1 }
 0x2dd   : > { %v1250_v45 = vadd.f32 %v1249_v44, %v3744_v59  ;;  %v1251_v46 = vpop.f32.mrb[13].mxu1 }
 0x2de   : > { %v1252_v48 = vadd.f32 %v1251_v46, %v3747_v60  ;;  %v1253_v49 = vpop.f32.mrb[14].mxu1  ;;  %v1348_v50 = vpack.c.bf16 %v1335_v43, %v1334_v41 }
 0x2df   : > { %2176 = vst [vmem:[%s3754_s4 + $0x60] sm:$0xff] %v1250_v45  ;;  %v1254_v51 = vadd.f32 %v1253_v49, %v3744_v59  ;;  %v1255_v52 = vpop.f32.mrb[15].mxu1 }
 0x2e0   : > { %v1320_v54 = vmul.f32 %v1304_v47, %v1252_v48  ;;  %2177 = vst [vmem:[%s3754_s4 + $0x68] sm:$0xff] %v1252_v48  ;;  %v1256_v55 = vadd.f32 %v1255_v52, %v3747_v60  ;;  %1515 = vmatmul.mubr.bf16.gmra.mrb[40].mxu0 %v1348_v50  ;;  %v1312_v48 = vld [vmem:[%s3659_s9 + $0x70] sm:$0xff] }
 0x2e1   : > { %2178 = vst [vmem:[%s3754_s4 + $0x70] sm:$0xff] %v1254_v51  ;;  %1524 = vmatprep.mubr.bf16.mxu0 %v3317_v27 }
 0x2e2   : > { %v1336_v56 = vadd.f32 %v1320_v54, %v1250_v45  ;;  %v1321_v57 = vmul.f32 %v1305_v53, %v1256_v55  ;;  %2179 = vst [vmem:[%s3754_s4 + $0x78] sm:$0xff] %v1256_v55  ;;  %v1313_v54 = vld [vmem:[%s3659_s9 + $0x78] sm:$0xff]  ;;  %s3318_s9 = smov [#allocation14]  }
 0x2e3   : > { %s3197_s23 = sshll.u32 %s3318_s9, 4  ;;  %s3198_s23 = int_to_ptr.vmem [resolvable:$false] %s3197_s23 }
 0x2e4   : > { %v1337_v58 = vadd.f32 %v1321_v57, %v1254_v51  ;;  %v1259_v61 = vpop.f32.mrb[16].mxu1  ;;  %s3199_s12 = scalar_lea.vmem %s3198_s23, 8192  ;;  %p3200_p3 = scmp.lt.s32.totalorder %s3890_s2, %s3198_s23 }
 0x2e5   : > { %v1260_v62 = vadd.f32 %v1259_v61, %v3744_v59  ;;  %v1261_v63 = vpop.f32.mrb[17].mxu1  ;;  %p3201_p5 = scmp.lt.s32.totalorder %s3199_s12, %s3193_s25 }
 0x2e6   : > { %v1262_v1 = vadd.f32 %v1261_v63, %v3747_v60  ;;  %v1263_v2 = vpop.f32.mrb[18].mxu1  ;;  %v1349_v3 = vpack.c.bf16 %v1337_v58, %v1336_v56  ;;  %v2889_v63 = vld [vmem:[#allocation11 + $0xe4] ss:$8 sps:$4 sm:$0xff]  }
 0x2e7   : > { %2180 = vst [vmem:[%s3754_s4 + $0x80] sm:$0xff] %v1260_v62  ;;  %v1264_v4 = vadd.f32 %v1263_v2, %v3744_v59  ;;  %v1265_v5 = vpop.f32.mrb[19].mxu1  ;;  %1855 = vmatprep.subr.bf16.mxu1 %v2889_v63  ;;  %p3202_p9 = por %p3201_p5, %p3200_p3 }
 0x2e8   : > { %v1322_v7 = vmul.f32 %v1306_v0, %v1262_v1  ;;  %2181 = vst [vmem:[%s3754_s4 + $0x88] sm:$0xff] %v1262_v1  ;;  %v1266_v8 = vadd.f32 %v1265_v5, %v3747_v60  ;;  %1525 = vmatmul.mubr.bf16.gmra.mrb[44].mxu0 %v1349_v3  ;;  %v2887_v0 = vld [vmem:[#allocation11 + $0xe0] ss:$8 sps:$4 sm:$0xff]   ;;  %v2890_v1 = vld [vmem:[#allocation11 + $0xf0] ss:$8 sps:$4 sm:$0xff]  }
 0x2e9   : > { %2182 = vst [vmem:[%s3754_s4 + $0x90] sm:$0xff] %v1264_v4  ;;  %1534 = vmatprep.mubr.bf16.mxu0 %v3317_v27  ;;  %1856 = vmatpush1.bf16.msra.mxu1 %v2887_v0  ;;  %p3203_p8 = pnand %p3202_p9, %p3196_p6 }
 0x2ea   : > { %v1338_v9 = vadd.f32 %v1322_v7, %v1260_v62  ;;  %v1323_v10 = vmul.f32 %v1307_v6, %v1266_v8  ;;  %2183 = vst [vmem:[%s3754_s4 + $0x98] sm:$0xff] %v1266_v8 }
 0x2ec   : > { %v1339_v11 = vadd.f32 %v1323_v10, %v1264_v4  ;;  %v1269_v12 = vpop.f32.mrb[20].mxu1 }
 0x2ed   : > { %v1270_v13 = vadd.f32 %v1269_v12, %v3744_v59  ;;  %v1271_v14 = vpop.f32.mrb[21].mxu1 }
 0x2ee   : > { %v1272_v16 = vadd.f32 %v1271_v14, %v3747_v60  ;;  %v1273_v17 = vpop.f32.mrb[22].mxu1  ;;  %v1350_v18 = vpack.c.bf16 %v1339_v11, %v1338_v9 }
 0x2ef   : > { %2184 = vst [vmem:[%s3754_s4 + $0xa0] sm:$0xff] %v1270_v13  ;;  %v1274_v19 = vadd.f32 %v1273_v17, %v3744_v59  ;;  %v1275_v20 = vpop.f32.mrb[23].mxu1 }
 0x2f0   : > { %v1324_v22 = vmul.f32 %v1308_v15, %v1272_v16  ;;  %2185 = vst [vmem:[%s3754_s4 + $0xa8] sm:$0xff] %v1272_v16  ;;  %v1276_v23 = vadd.f32 %v1275_v20, %v3747_v60  ;;  %1535 = vmatmul.mubr.bf16.gmra.mrb[48].mxu0 %v1350_v18 }
 0x2f1   : > { %2186 = vst [vmem:[%s3754_s4 + $0xb0] sm:$0xff] %v1274_v19  ;;  %1544 = vmatprep.mubr.bf16.mxu0 %v3317_v27 }
 0x2f2   : > { %v1340_v24 = vadd.f32 %v1324_v22, %v1270_v13  ;;  %v1325_v25 = vmul.f32 %v1309_v21, %v1276_v23  ;;  %2187 = vst [vmem:[%s3754_s4 + $0xb8] sm:$0xff] %v1276_v23 }
 0x2f4   : > { %v1341_v26 = vadd.f32 %v1325_v25, %v1274_v19  ;;  %v1279_v35 = vpop.f32.mrb[24].mxu1 }
 0x2f5   : > { %v1280_v28 = vadd.f32 %v1279_v35, %v3744_v59  ;;  %v1281_v29 = vpop.f32.mrb[25].mxu1 }
 0x2f6   : > { %v1282_v30 = vadd.f32 %v1281_v29, %v3747_v60  ;;  %v1283_v31 = vpop.f32.mrb[26].mxu1  ;;  %v1351_v33 = vpack.c.bf16 %v1341_v26, %v1340_v24 }
 0x2f7   : > { %2188 = vst [vmem:[%s3754_s4 + $0xc0] sm:$0xff] %v1280_v28  ;;  %v1284_v37 = vadd.f32 %v1283_v31, %v3744_v59  ;;  %v1285_v38 = vpop.f32.mrb[27].mxu1 }
 0x2f8   : > { %v1326_v40 = vmul.f32 %v1310_v36, %v1282_v30  ;;  %2189 = vst [vmem:[%s3754_s4 + $0xc8] sm:$0xff] %v1282_v30  ;;  %v1286_v41 = vadd.f32 %v1285_v38, %v3747_v60  ;;  %1545 = vmatmul.mubr.bf16.gmra.mrb[52].mxu0 %v1351_v33 }
 0x2f9   : > { %2190 = vst [vmem:[%s3754_s4 + $0xd0] sm:$0xff] %v1284_v37  ;;  %1554 = vmatprep.mubr.bf16.mxu0 %v3317_v27 }
 0x2fa   : > { %v1342_v42 = vadd.f32 %v1326_v40, %v1280_v28  ;;  %v1327_v43 = vmul.f32 %v1311_v39, %v1286_v41  ;;  %2191 = vst [vmem:[%s3754_s4 + $0xd8] sm:$0xff] %v1286_v41 }
 0x2fc   : > { %v1343_v44 = vadd.f32 %v1327_v43, %v1284_v37  ;;  %v1289_v45 = vpop.f32.mrb[28].mxu1 }
 0x2fd   : > { %v1290_v46 = vadd.f32 %v1289_v45, %v3744_v59  ;;  %v1291_v47 = vpop.f32.mrb[29].mxu1 }
 0x2fe   : > { %v1292_v49 = vadd.f32 %v1291_v47, %v3747_v60  ;;  %v1293_v50 = vpop.f32.mrb[30].mxu1  ;;  %v1352_v51 = vpack.c.bf16 %v1343_v44, %v1342_v42 }
 0x2ff   : > { %2192 = vst [vmem:[%s3754_s4 + $0xe0] sm:$0xff] %v1290_v46  ;;  %v1294_v52 = vadd.f32 %v1293_v50, %v3744_v59  ;;  %v1295_v53 = vpop.f32.mrb[31].mxu1  ;;  %v2892_v59 = vld [vmem:[#allocation11 + $0xf4] ss:$8 sps:$4 sm:$0xff]  }
 0x300   : > { %v1328_v55 = vmul.f32 %v1312_v48, %v1292_v49  ;;  %2193 = vst [vmem:[%s3754_s4 + $0xe8] sm:$0xff] %v1292_v49  ;;  %v1296_v56 = vadd.f32 %v1295_v53, %v3747_v60  ;;  %1555 = vmatmul.mubr.bf16.gmra.mrb[56].mxu0 %v1352_v51  ;;  %1857 = vmatprep.subr.bf16.mxu1 %v2892_v59  ;;  %v1370_v60 = vld [vmem:[%s4058_s7] sm:$0x3] }
 0x301   : > { %2194 = vst [vmem:[%s3754_s4 + $0xf0] sm:$0xff] %v1294_v52  ;;  %1564 = vmatprep.mubr.bf16.mxu0 %v3317_v27  ;;  %1858 = vmatpush1.bf16.msra.mxu1 %v2890_v1  ;;  %v3844_v27 = vrot.slane %v1370_v60, %v3693_v32  ;;  %v3847_v2 = vrot.slane %v1370_v60, %v3698_v34 }
 0x302   : > { %v1344_v57 = vadd.f32 %v1328_v55, %v1290_v46  ;;  %v1329_v58 = vmul.f32 %v1313_v54, %v1296_v56  ;;  %2195 = vst [vmem:[%s3754_s4 + $0xf8] sm:$0xff] %v1296_v56 }
 0x304   : > { %v1345_v61 = vadd.f32 %v1329_v58, %v1294_v52 }
 0x306   : > { %v1353_v62 = vpack.c.bf16 %v1345_v61, %v1344_v57 }
 0x308   : > { %1565 = vmatmul.mubr.bf16.gmra.mrb[60].mxu0 %v1353_v62 }
 0x3a3   : > { %v1496_v3 = vpop.f32.mrb[32].mxu0 }
 0x3a4   : > { %v1497_v4 = vadd.f32 %v1496_v3, %v3844_v27  ;;  %v1498_v5 = vpop.f32.mrb[33].mxu0 }
 0x3a5   : > { %v1499_v6 = vadd.f32 %v1498_v5, %v3847_v2  ;;  %v1500_v7 = vpop.f32.mrb[34].mxu0 }
 0x3a6   : > { %v1501_v8 = vadd.f32 %v1500_v7, %v3844_v27  ;;  %v1502_v9 = vpop.f32.mrb[35].mxu0  ;;  %v1575_v11 = vmax.f32 %v1497_v4, 0.0 }
 0x3a7   : > { %v1503_v10 = vadd.f32 %v1502_v9, %v3847_v2  ;;  %v1576_v13 = vmax.f32 %v1499_v6, 0.0 }
 0x3a8   : > { %v1577_v12 = vmax.f32 %v1501_v8, 0.0 }
 0x3a9   : > { %v1578_v14 = vmax.f32 %v1503_v10, 0.0 }
 0x3aa   : > { %v1607_v15 = vpack.c.bf16 %v1577_v12, %v1575_v11 }
 0x3ab   : > { %v1608_v16 = vpack.c.bf16 %v1578_v14, %v1576_v13  ;;  %v1506_v17 = vpop.f32.mrb[36].mxu0 }
 0x3ac   : > { %v1507_v18 = vadd.f32 %v1506_v17, %v3844_v27  ;;  %v1508_v19 = vpop.f32.mrb[37].mxu0 }
 0x3ad   : > { %v1509_v20 = vadd.f32 %v1508_v19, %v3847_v2  ;;  %v1510_v21 = vpop.f32.mrb[38].mxu0  ;;  %1859 = vmatprep.mubr.bf16.mxu1 %v1608_v16 }
 0x3ae   : > { %v1511_v22 = vadd.f32 %v1510_v21, %v3844_v27  ;;  %v1512_v23 = vpop.f32.mrb[39].mxu0  ;;  %1860 = vmatmul.mubr.bf16.vlgmr.msra.gmra.mrb[32].mxu1 %v1607_v15  ;;  %v1579_v25 = vmax.f32 %v1507_v18, 0.0 }
 0x3af   : > { %v1513_v24 = vadd.f32 %v1512_v23, %v3847_v2  ;;  %v1580_v35 = vmax.f32 %v1509_v20, 0.0 }
 0x3b0   : > { %v1581_v26 = vmax.f32 %v1511_v22, 0.0 }
 0x3b1   : > { %v1582_v28 = vmax.f32 %v1513_v24, 0.0 }
 0x3b2   : > { %v1609_v29 = vpack.c.bf16 %v1581_v26, %v1579_v25 }
 0x3b3   : > { %v1610_v36 = vpack.c.bf16 %v1582_v28, %v1580_v35  ;;  %v1516_v30 = vpop.f32.mrb[40].mxu0 }
 0x3b4   : > { %v1517_v31 = vadd.f32 %v1516_v30, %v3844_v27  ;;  %v1518_v33 = vpop.f32.mrb[41].mxu0 }
 0x3b5   : > { %v1519_v37 = vadd.f32 %v1518_v33, %v3847_v2  ;;  %v1520_v38 = vpop.f32.mrb[42].mxu0  ;;  %1869 = vmatprep.mubr.bf16.mxu1 %v1610_v36 }
 0x3b6   : > { %v1521_v39 = vadd.f32 %v1520_v38, %v3844_v27  ;;  %v1522_v40 = vpop.f32.mrb[43].mxu0  ;;  %1870 = vmatmul.mubr.bf16.gmra.mrb[36].mxu1 %v1609_v29  ;;  %v1583_v42 = vmax.f32 %v1517_v31, 0.0 }
 0x3b7   : > { %v1523_v41 = vadd.f32 %v1522_v40, %v3847_v2  ;;  %v1584_v44 = vmax.f32 %v1519_v37, 0.0 }
 0x3b8   : > { %v1585_v43 = vmax.f32 %v1521_v39, 0.0 }
 0x3b9   : > { %v1586_v45 = vmax.f32 %v1523_v41, 0.0 }
 0x3ba   : > { %v1611_v46 = vpack.c.bf16 %v1585_v43, %v1583_v42 }
 0x3bb   : > { %v1612_v47 = vpack.c.bf16 %v1586_v45, %v1584_v44  ;;  %v1526_v48 = vpop.f32.mrb[44].mxu0 }
 0x3bc   : > { %v1527_v49 = vadd.f32 %v1526_v48, %v3844_v27  ;;  %v1528_v50 = vpop.f32.mrb[45].mxu0 }
 0x3bd   : > { %v1529_v51 = vadd.f32 %v1528_v50, %v3847_v2  ;;  %v1530_v52 = vpop.f32.mrb[46].mxu0  ;;  %1879 = vmatprep.mubr.bf16.mxu1 %v1612_v47 }
 0x3be   : > { %v1531_v53 = vadd.f32 %v1530_v52, %v3844_v27  ;;  %v1532_v54 = vpop.f32.mrb[47].mxu0  ;;  %1880 = vmatmul.mubr.bf16.gmra.mrb[40].mxu1 %v1611_v46  ;;  %v1587_v56 = vmax.f32 %v1527_v49, 0.0 }
 0x3bf   : > { %v1533_v55 = vadd.f32 %v1532_v54, %v3847_v2  ;;  %v1588_v58 = vmax.f32 %v1529_v51, 0.0 }
 0x3c0   : > { %v1589_v57 = vmax.f32 %v1531_v53, 0.0 }
 0x3c1   : > { %v1590_v61 = vmax.f32 %v1533_v55, 0.0 }
 0x3c2   : > { %v1613_v62 = vpack.c.bf16 %v1589_v57, %v1587_v56 }
 0x3c3   : > { %v1614_v63 = vpack.c.bf16 %v1590_v61, %v1588_v58  ;;  %v1536_v0 = vpop.f32.mrb[48].mxu0 }
 0x3c4   : > { %v1537_v59 = vadd.f32 %v1536_v0, %v3844_v27  ;;  %v1538_v1 = vpop.f32.mrb[49].mxu0 }
 0x3c5   : > { %v1539_v60 = vadd.f32 %v1538_v1, %v3847_v2  ;;  %v1540_v3 = vpop.f32.mrb[50].mxu0  ;;  %1889 = vmatprep.mubr.bf16.mxu1 %v1614_v63 }
 0x3c6   : > { %v1541_v4 = vadd.f32 %v1540_v3, %v3844_v27  ;;  %v1542_v5 = vpop.f32.mrb[51].mxu0  ;;  %1890 = vmatmul.mubr.bf16.gmra.mrb[44].mxu1 %v1613_v62  ;;  %v1591_v7 = vmax.f32 %v1537_v59, 0.0 }
 0x3c7   : > { %v1543_v6 = vadd.f32 %v1542_v5, %v3847_v2  ;;  %v1592_v9 = vmax.f32 %v1539_v60, 0.0 }
 0x3c8   : > { %v1593_v8 = vmax.f32 %v1541_v4, 0.0 }
 0x3c9   : > { %v1594_v10 = vmax.f32 %v1543_v6, 0.0 }
 0x3ca   : > { %v1615_v11 = vpack.c.bf16 %v1593_v8, %v1591_v7 }
 0x3cb   : > { %v1616_v12 = vpack.c.bf16 %v1594_v10, %v1592_v9  ;;  %v1546_v13 = vpop.f32.mrb[52].mxu0 }
 0x3cc   : > { %v1547_v14 = vadd.f32 %v1546_v13, %v3844_v27  ;;  %v1548_v15 = vpop.f32.mrb[53].mxu0 }
 0x3cd   : > { %v1549_v16 = vadd.f32 %v1548_v15, %v3847_v2  ;;  %v1550_v17 = vpop.f32.mrb[54].mxu0  ;;  %1899 = vmatprep.mubr.bf16.mxu1 %v1616_v12 }
 0x3ce   : > { %v1551_v18 = vadd.f32 %v1550_v17, %v3844_v27  ;;  %v1552_v19 = vpop.f32.mrb[55].mxu0  ;;  %1900 = vmatmul.mubr.bf16.gmra.mrb[48].mxu1 %v1615_v11  ;;  %v1595_v21 = vmax.f32 %v1547_v14, 0.0 }
 0x3cf   : > { %v1553_v20 = vadd.f32 %v1552_v19, %v3847_v2  ;;  %v1596_v23 = vmax.f32 %v1549_v16, 0.0 }
 0x3d0   : > { %v1597_v22 = vmax.f32 %v1551_v18, 0.0 }
 0x3d1   : > { %v1598_v24 = vmax.f32 %v1553_v20, 0.0 }
 0x3d2   : > { %v1617_v25 = vpack.c.bf16 %v1597_v22, %v1595_v21 }
 0x3d3   : > { %v1618_v26 = vpack.c.bf16 %v1598_v24, %v1596_v23  ;;  %v1556_v35 = vpop.f32.mrb[56].mxu0 }
 0x3d4   : > { %v1557_v28 = vadd.f32 %v1556_v35, %v3844_v27  ;;  %v1558_v29 = vpop.f32.mrb[57].mxu0 }
 0x3d5   : > { %v1559_v36 = vadd.f32 %v1558_v29, %v3847_v2  ;;  %v1560_v30 = vpop.f32.mrb[58].mxu0  ;;  %1909 = vmatprep.mubr.bf16.mxu1 %v1618_v26 }
 0x3d6   : > { %v1561_v31 = vadd.f32 %v1560_v30, %v3844_v27  ;;  %v1562_v33 = vpop.f32.mrb[59].mxu0  ;;  %1910 = vmatmul.mubr.bf16.gmra.mrb[52].mxu1 %v1617_v25  ;;  %v1599_v38 = vmax.f32 %v1557_v28, 0.0 }
 0x3d7   : > { %v1563_v37 = vadd.f32 %v1562_v33, %v3847_v2  ;;  %v1600_v40 = vmax.f32 %v1559_v36, 0.0 }
 0x3d8   : > { %v1601_v39 = vmax.f32 %v1561_v31, 0.0 }
 0x3d9   : > { %v1602_v41 = vmax.f32 %v1563_v37, 0.0 }
 0x3da   : > { %v1619_v42 = vpack.c.bf16 %v1601_v39, %v1599_v38 }
 0x3db   : > { %v1620_v43 = vpack.c.bf16 %v1602_v41, %v1600_v40  ;;  %v1566_v44 = vpop.f32.mrb[60].mxu0 }
 0x3dc   : > { %v1567_v45 = vadd.f32 %v1566_v44, %v3844_v27  ;;  %v1568_v46 = vpop.f32.mrb[61].mxu0 }
 0x3dd   : > { %v1569_v47 = vadd.f32 %v1568_v46, %v3847_v2  ;;  %v1570_v48 = vpop.f32.mrb[62].mxu0  ;;  %1919 = vmatprep.mubr.bf16.mxu1 %v1620_v43 }
 0x3de   : > { %v1571_v49 = vadd.f32 %v1570_v48, %v3844_v27  ;;  %v1572_v50 = vpop.f32.mrb[63].mxu0  ;;  %1920 = vmatmul.mubr.bf16.gmra.mrb[56].mxu1 %v1619_v42  ;;  %v1603_v52 = vmax.f32 %v1567_v45, 0.0 }
 0x3df   : > { %v1573_v51 = vadd.f32 %v1572_v50, %v3847_v2  ;;  %v1604_v54 = vmax.f32 %v1569_v47, 0.0 }
 0x3e0   : > { %v1605_v53 = vmax.f32 %v1571_v49, 0.0 }
 0x3e1   : > { %v1606_v55 = vmax.f32 %v1573_v51, 0.0 }
 0x3e2   : > { %v1621_v56 = vpack.c.bf16 %v1605_v53, %v1603_v52 }
 0x3e3   : > { %v1622_v57 = vpack.c.bf16 %v1606_v55, %v1604_v54 }
 0x3e5   : > { %1929 = vmatprep.mubr.bf16.mxu1 %v1622_v57 }
 0x3e6   : > { %1930 = vmatmul.mubr.bf16.gmra.mrb[60].mxu1 %v1621_v56 }
 0x3e7   : > { %3206 = shalt.err (!%p3203_p8)
}
 0x3e8   : > { %s3207_s14 = scalar_lea.hbm %s3887_s26, 4096  ;;  %s3211_s29 = scalar_lea.hbm %s4103_s11, 8192 }
 0x3e9   : > { %p3208_p11 = scmp.ne.s32.totalorder %s3887_s26, %s3207_s14  ;;  %p3212_p1 = scmp.lt.u32.totalorder %s3887_s26, %s4103_s11 }
 0x3ea   : > { %p3213_p2 = scmp.lt.u32.totalorder %s3211_s29, %s3207_s14  ;;  %p3215_p0 = scmp.lt.u32.totalorder %s3207_s14, %s3887_s26 }
 0x3eb   : > { %p3209_p7 = pnand %p3208_p11, %p3553_p10 }
 0x3ec   : > { %p3214_p13 = por %p3213_p2, %p3212_p1 }
 0x3ed   : > { %p3210_p12 = pneg %p3209_p7 }
 0x3ee   : > { %p3216_p4 = por %p3215_p0, %p3214_p13 }
 0x3f0   : > { %p3217_p6 = pnand %p3216_p4, %p3210_p12 }
 0x3f2   : > { %3220 = shalt.err (!%p3217_p6)
}
 0x3f3   : > { %s3319_s0 = smov 256   ;;  %s3320_s25 = smov 16  }
 0x3f4   : > { %2620 = dma.vmem_to_hbm [thread:$0]  (%p3553_p10), %s3890_s2, 4096, %s3887_s26, %s2202_s15, %s3319_s0, %s3319_s0, %s3320_s25  }
 0x3f5   : > { %s4104_s12 = sld [smem:[#allocation28_spill]]  ;;  %s3946_s26 = scalar_lea.vmem [#allocation13], %s2420_s10 }
 0x3f6   : > { %s2216_s10 = sshll.u32 %s3946_s26, 4  ;;  %s4105_s14 = sld [smem:[#allocation29_spill]]  ;;  %s4002_s10 = int_to_ptr.vmem [resolvable:$true] %s2216_s10 }
 0x3f7   : > { %s2197_s4 = scalar_lea.sflag [#allocation4], %s3648_s28  ;;  %s3221_s29 = scalar_lea.vmem %s4002_s10, 4096 }
 0x3f8   : > { %p3222_p3 = scmp.ne.s32.totalorder %s4002_s10, %s3221_s29  ;;  %s3321_s21 = smov [#allocation13]  }
 0x3f9   : > { %s3225_s16 = sshll.u32 %s3321_s21, 4  ;;  %s3226_s16 = int_to_ptr.vmem [resolvable:$false] %s3225_s16 }
 0x3fa   : > { %p3223_p5 = pnand %p3222_p3, %p3553_p10  ;;  %s3227_s30 = scalar_lea.vmem %s3226_s16, 8192 }
 0x3fb   : > { %v1655_v27 = vld [vmem:[%s4104_s12] sm:$0x3]  ;;  %p3228_p8 = scmp.lt.s32.totalorder %s4002_s10, %s3226_s16  ;;  %p3229_p11 = scmp.lt.s32.totalorder %s3227_s30, %s3221_s29 }
 0x3fc   : > { %v3923_v2 = vrot.slane %v1655_v27, %v3693_v32  ;;  %v3926_v58 = vrot.slane %v1655_v27, %v3698_v34  ;;  %s4000_s13 = scalar_lea.hbm %s4105_s14, %s2596_s27  ;;  %p3224_p9 = pneg %p3223_p5 }
 0x3fd   : > { %p3230_p7 = por %p3229_p11, %p3228_p8 }
 0x3ff   : > { %p3231_p12 = pnand %p3230_p7, %p3224_p9 }
 0x481   : > { %v1861_v61 = vpop.f32.mrb[32].mxu1 }
 0x482   : > { %v1862_v62 = vadd.f32 %v1861_v61, %v3923_v2  ;;  %v1863_v63 = vpop.f32.mrb[33].mxu1 }
 0x483   : > { %v1864_v0 = vadd.f32 %v1863_v63, %v3926_v58  ;;  %v1865_v59 = vpop.f32.mrb[34].mxu1 }
 0x484   : > { %v2550_v1 = vmul.f32 -1.442695, %v1862_v62  ;;  %v1866_v60 = vadd.f32 %v1865_v59, %v3923_v2  ;;  %v1867_v3 = vpop.f32.mrb[35].mxu1 }
 0x485   : > { %v2551_v4 = vmul.f32 -1.442695, %v1864_v0  ;;  %v1868_v5 = vadd.f32 %v1867_v3, %v3926_v58 }
 0x486   : > { %2893 = vpow2.f32 %v2550_v1  ;;  %v2552_v32 = vmul.f32 -1.442695, %v1866_v60 }
 0x487   : > { %2895 = vpow2.f32 %v2551_v4  ;;  %v2553_v6 = vmul.f32 -1.442695, %v1868_v5 }
 0x488   : > { %2897 = vpow2.f32 %v2552_v32 }
 0x489   : > { %2899 = vpow2.f32 %v2553_v6  ;;  %v1871_v34 = vpop.f32.mrb[36].mxu1 }
 0x48a   : > { %v1872_v7 = vadd.f32 %v1871_v34, %v3923_v2  ;;  %v1873_v8 = vpop.f32.mrb[37].mxu1 }
 0x48b   : > { %v1874_v9 = vadd.f32 %v1873_v8, %v3926_v58  ;;  %v1875_v10 = vpop.f32.mrb[38].mxu1 }
 0x48c   : > { %v2554_v11 = vmul.f32 -1.442695, %v1872_v7  ;;  %v1876_v12 = vadd.f32 %v1875_v10, %v3923_v2  ;;  %v1877_v13 = vpop.f32.mrb[39].mxu1 }
 0x48d   : > { %v2555_v14 = vmul.f32 -1.442695, %v1874_v9  ;;  %v1878_v15 = vadd.f32 %v1877_v13, %v3926_v58 }
 0x48e   : > { %2901 = vpow2.f32 %v2554_v11  ;;  %v2556_v16 = vmul.f32 -1.442695, %v1876_v12 }
 0x48f   : > { %2903 = vpow2.f32 %v2555_v14  ;;  %v2557_v17 = vmul.f32 -1.442695, %v1878_v15 }
 0x490   : > { %v2894_v18 = vpop.eup %2893  ;;  %2905 = vpow2.f32 %v2556_v16 }
 0x491   : > { %v2896_v19 = vpop.eup %2895  ;;  %v2036_v20 = vadd.f32 1.0, %v2894_v18  ;;  %2907 = vpow2.f32 %v2557_v17  ;;  %v1881_v21 = vpop.f32.mrb[40].mxu1 }
 0x492   : > { %v2898_v22 = vpop.eup %2897  ;;  %v2037_v23 = vadd.f32 1.0, %v2896_v19  ;;  %v1882_v24 = vadd.f32 %v1881_v21, %v3923_v2  ;;  %v1883_v25 = vpop.f32.mrb[41].mxu1 }
 0x493   : > { %v2900_v26 = vpop.eup %2899  ;;  %2909 = vrcp.f32 %v2036_v20  ;;  %v2038_v35 = vadd.f32 1.0, %v2898_v22  ;;  %v1884_v28 = vadd.f32 %v1883_v25, %v3926_v58  ;;  %v1885_v29 = vpop.f32.mrb[42].mxu1 }
 0x494   : > { %2911 = vrcp.f32 %v2037_v23  ;;  %v2039_v36 = vadd.f32 1.0, %v2900_v26  ;;  %v2558_v30 = vmul.f32 -1.442695, %v1882_v24  ;;  %v1886_v31 = vadd.f32 %v1885_v29, %v3923_v2  ;;  %v1887_v33 = vpop.f32.mrb[43].mxu1 }
 0x495   : > { %2913 = vrcp.f32 %v2038_v35  ;;  %v2559_v37 = vmul.f32 -1.442695, %v1884_v28  ;;  %v1888_v38 = vadd.f32 %v1887_v33, %v3926_v58 }
 0x496   : > { %2915 = vrcp.f32 %v2039_v36  ;;  %v2560_v39 = vmul.f32 -1.442695, %v1886_v31 }
 0x497   : > { %2917 = vpow2.f32 %v2558_v30  ;;  %v2561_v40 = vmul.f32 -1.442695, %v1888_v38 }
 0x498   : > { %v2902_v41 = vpop.eup %2901  ;;  %2919 = vpow2.f32 %v2559_v37 }
 0x499   : > { %v2904_v42 = vpop.eup %2903  ;;  %v2040_v43 = vadd.f32 1.0, %v2902_v41  ;;  %2921 = vpow2.f32 %v2560_v39  ;;  %v1891_v44 = vpop.f32.mrb[44].mxu1 }
 0x49a   : > { %v2906_v45 = vpop.eup %2905  ;;  %v2041_v46 = vadd.f32 1.0, %v2904_v42  ;;  %2923 = vpow2.f32 %v2561_v40  ;;  %v1892_v47 = vadd.f32 %v1891_v44, %v3923_v2  ;;  %v1893_v48 = vpop.f32.mrb[45].mxu1 }
 0x49b   : > { %v2908_v49 = vpop.eup %2907  ;;  %2925 = vrcp.f32 %v2040_v43  ;;  %v2042_v50 = vadd.f32 1.0, %v2906_v45  ;;  %v1894_v51 = vadd.f32 %v1893_v48, %v3926_v58  ;;  %v1895_v52 = vpop.f32.mrb[46].mxu1 }
 0x49c   : > { %2927 = vrcp.f32 %v2041_v46  ;;  %v2043_v53 = vadd.f32 1.0, %v2908_v49  ;;  %v2562_v54 = vmul.f32 -1.442695, %v1892_v47  ;;  %v1896_v55 = vadd.f32 %v1895_v52, %v3923_v2  ;;  %v1897_v56 = vpop.f32.mrb[47].mxu1 }
 0x49d   : > { %v2910_v57 = vpop.eup %2909  ;;  %2929 = vrcp.f32 %v2042_v50  ;;  %v2563_v27 = vmul.f32 -1.442695, %v1894_v51  ;;  %v1898_v61 = vadd.f32 %v1897_v56, %v3926_v58 }
 0x49e   : > { %v2912_v62 = vpop.eup %2911  ;;  %2132 = vst [vmem:[%s3946_s26] sm:$0xff] %v2910_v57  ;;  %2931 = vrcp.f32 %v2043_v53  ;;  %v2564_v63 = vmul.f32 -1.442695, %v1896_v55 }
 0x49f   : > { %v2914_v0 = vpop.eup %2913  ;;  %2133 = vst [vmem:[%s3946_s26 + $0x8] sm:$0xff] %v2912_v62  ;;  %2933 = vpow2.f32 %v2562_v54  ;;  %v2565_v59 = vmul.f32 -1.442695, %v1898_v61 }
 0x4a0   : > { %v2916_v1 = vpop.eup %2915  ;;  %2134 = vst [vmem:[%s3946_s26 + $0x10] sm:$0xff] %v2914_v0  ;;  %2935 = vpow2.f32 %v2563_v27 }
 0x4a1   : > { %v2918_v60 = vpop.eup %2917  ;;  %2135 = vst [vmem:[%s3946_s26 + $0x18] sm:$0xff] %v2916_v1  ;;  %2937 = vpow2.f32 %v2564_v63  ;;  %v1901_v3 = vpop.f32.mrb[48].mxu1 }
 0x4a2   : > { %v2920_v4 = vpop.eup %2919  ;;  %v2044_v5 = vadd.f32 1.0, %v2918_v60  ;;  %2939 = vpow2.f32 %v2565_v59  ;;  %v1902_v32 = vadd.f32 %v1901_v3, %v3923_v2  ;;  %v1903_v6 = vpop.f32.mrb[49].mxu1 }
 0x4a3   : > { %v2922_v34 = vpop.eup %2921  ;;  %v2045_v7 = vadd.f32 1.0, %v2920_v4  ;;  %v1904_v8 = vadd.f32 %v1903_v6, %v3926_v58  ;;  %v1905_v9 = vpop.f32.mrb[50].mxu1 }
 0x4a4   : > { %v2924_v10 = vpop.eup %2923  ;;  %2941 = vrcp.f32 %v2044_v5  ;;  %v2046_v11 = vadd.f32 1.0, %v2922_v34  ;;  %v2566_v12 = vmul.f32 -1.442695, %v1902_v32  ;;  %v1906_v13 = vadd.f32 %v1905_v9, %v3923_v2  ;;  %v1907_v14 = vpop.f32.mrb[51].mxu1 }
 0x4a5   : > { %v2926_v15 = vpop.eup %2925  ;;  %2943 = vrcp.f32 %v2045_v7  ;;  %v2047_v16 = vadd.f32 1.0, %v2924_v10  ;;  %v2567_v17 = vmul.f32 -1.442695, %v1904_v8  ;;  %v1908_v18 = vadd.f32 %v1907_v14, %v3926_v58 }
 0x4a6   : > { %v2928_v19 = vpop.eup %2927  ;;  %2136 = vst [vmem:[%s3946_s26 + $0x20] sm:$0xff] %v2926_v15  ;;  %2945 = vrcp.f32 %v2046_v11  ;;  %v2568_v20 = vmul.f32 -1.442695, %v1906_v13 }
 0x4a7   : > { %v2930_v21 = vpop.eup %2929  ;;  %2137 = vst [vmem:[%s3946_s26 + $0x28] sm:$0xff] %v2928_v19  ;;  %2947 = vrcp.f32 %v2047_v16  ;;  %v2569_v22 = vmul.f32 -1.442695, %v1908_v18 }
 0x4a8   : > { %v2932_v23 = vpop.eup %2931  ;;  %2138 = vst [vmem:[%s3946_s26 + $0x30] sm:$0xff] %v2930_v21  ;;  %2949 = vpow2.f32 %v2566_v12 }
 0x4a9   : > { %v2934_v24 = vpop.eup %2933  ;;  %2139 = vst [vmem:[%s3946_s26 + $0x38] sm:$0xff] %v2932_v23  ;;  %2951 = vpow2.f32 %v2567_v17  ;;  %v1911_v25 = vpop.f32.mrb[52].mxu1 }
 0x4aa   : > { %v2936_v26 = vpop.eup %2935  ;;  %v2048_v35 = vadd.f32 1.0, %v2934_v24  ;;  %2953 = vpow2.f32 %v2568_v20  ;;  %v1912_v28 = vadd.f32 %v1911_v25, %v3923_v2  ;;  %v1913_v29 = vpop.f32.mrb[53].mxu1 }
 0x4ab   : > { %v2938_v36 = vpop.eup %2937  ;;  %v2049_v30 = vadd.f32 1.0, %v2936_v26  ;;  %2955 = vpow2.f32 %v2569_v22  ;;  %v1914_v31 = vadd.f32 %v1913_v29, %v3926_v58  ;;  %v1915_v33 = vpop.f32.mrb[54].mxu1 }
 0x4ac   : > { %v2940_v37 = vpop.eup %2939  ;;  %2957 = vrcp.f32 %v2048_v35  ;;  %v2050_v38 = vadd.f32 1.0, %v2938_v36  ;;  %v2570_v39 = vmul.f32 -1.442695, %v1912_v28  ;;  %v1916_v40 = vadd.f32 %v1915_v33, %v3923_v2  ;;  %v1917_v41 = vpop.f32.mrb[55].mxu1 }
 0x4ad   : > { %2959 = vrcp.f32 %v2049_v30  ;;  %v2051_v42 = vadd.f32 1.0, %v2940_v37  ;;  %v2571_v43 = vmul.f32 -1.442695, %v1914_v31  ;;  %v1918_v44 = vadd.f32 %v1917_v41, %v3926_v58 }
 0x4ae   : > { %v2942_v45 = vpop.eup %2941  ;;  %2961 = vrcp.f32 %v2050_v38  ;;  %v2572_v46 = vmul.f32 -1.442695, %v1916_v40 }
 0x4af   : > { %v2944_v47 = vpop.eup %2943  ;;  %2140 = vst [vmem:[%s3946_s26 + $0x40] sm:$0xff] %v2942_v45  ;;  %2963 = vrcp.f32 %v2051_v42  ;;  %v2573_v48 = vmul.f32 -1.442695, %v1918_v44 }
 0x4b0   : > { %v2946_v49 = vpop.eup %2945  ;;  %2141 = vst [vmem:[%s3946_s26 + $0x48] sm:$0xff] %v2944_v47  ;;  %2965 = vpow2.f32 %v2570_v39 }
 0x4b1   : > { %v2948_v50 = vpop.eup %2947  ;;  %2142 = vst [vmem:[%s3946_s26 + $0x50] sm:$0xff] %v2946_v49  ;;  %2967 = vpow2.f32 %v2571_v43  ;;  %v1921_v51 = vpop.f32.mrb[56].mxu1 }
 0x4b2   : > { %v2950_v52 = vpop.eup %2949  ;;  %2143 = vst [vmem:[%s3946_s26 + $0x58] sm:$0xff] %v2948_v50  ;;  %2969 = vpow2.f32 %v2572_v46  ;;  %v1922_v53 = vadd.f32 %v1921_v51, %v3923_v2  ;;  %v1923_v54 = vpop.f32.mrb[57].mxu1 }
 0x4b3   : > { %v2952_v55 = vpop.eup %2951  ;;  %v2052_v56 = vadd.f32 1.0, %v2950_v52  ;;  %2971 = vpow2.f32 %v2573_v48  ;;  %v1924_v57 = vadd.f32 %v1923_v54, %v3926_v58  ;;  %v1925_v27 = vpop.f32.mrb[58].mxu1 }
 0x4b4   : > { %v2954_v61 = vpop.eup %2953  ;;  %v2053_v62 = vadd.f32 1.0, %v2952_v55  ;;  %v1926_v63 = vadd.f32 %v1925_v27, %v3923_v2  ;;  %v1927_v0 = vpop.f32.mrb[59].mxu1  ;;  %v2574_v60 = vmul.f32 -1.442695, %v1922_v53 }
 0x4b5   : > { %v2956_v59 = vpop.eup %2955  ;;  %2973 = vrcp.f32 %v2052_v56  ;;  %v2054_v1 = vadd.f32 1.0, %v2954_v61  ;;  %v1928_v3 = vadd.f32 %v1927_v0, %v3926_v58  ;;  %v2575_v32 = vmul.f32 -1.442695, %v1924_v57 }
 0x4b6   : > { %v2958_v4 = vpop.eup %2957  ;;  %2975 = vrcp.f32 %v2053_v62  ;;  %v2055_v5 = vadd.f32 1.0, %v2956_v59  ;;  %v2576_v34 = vmul.f32 -1.442695, %v1926_v63 }
 0x4b7   : > { %v2960_v6 = vpop.eup %2959  ;;  %2144 = vst [vmem:[%s3946_s26 + $0x60] sm:$0xff] %v2958_v4  ;;  %2977 = vrcp.f32 %v2054_v1  ;;  %v2577_v8 = vmul.f32 -1.442695, %v1928_v3 }
 0x4b8   : > { %v2962_v7 = vpop.eup %2961  ;;  %2145 = vst [vmem:[%s3946_s26 + $0x68] sm:$0xff] %v2960_v6  ;;  %2979 = vrcp.f32 %v2055_v5 }
 0x4b9   : > { %v2964_v9 = vpop.eup %2963  ;;  %2146 = vst [vmem:[%s3946_s26 + $0x70] sm:$0xff] %v2962_v7  ;;  %2981 = vpow2.f32 %v2574_v60  ;;  %v1931_v10 = vpop.f32.mrb[60].mxu1 }
 0x4ba   : > { %v2966_v11 = vpop.eup %2965  ;;  %2147 = vst [vmem:[%s3946_s26 + $0x78] sm:$0xff] %v2964_v9  ;;  %2983 = vpow2.f32 %v2575_v32  ;;  %v1932_v12 = vadd.f32 %v1931_v10, %v3923_v2  ;;  %v1933_v13 = vpop.f32.mrb[61].mxu1 }
 0x4bb   : > { %v2968_v14 = vpop.eup %2967  ;;  %v2056_v15 = vadd.f32 1.0, %v2966_v11  ;;  %2985 = vpow2.f32 %v2576_v34  ;;  %v1934_v16 = vadd.f32 %v1933_v13, %v3926_v58  ;;  %v1935_v17 = vpop.f32.mrb[62].mxu1 }
 0x4bc   : > { %v2970_v18 = vpop.eup %2969  ;;  %v2057_v19 = vadd.f32 1.0, %v2968_v14  ;;  %2987 = vpow2.f32 %v2577_v8  ;;  %v1936_v20 = vadd.f32 %v1935_v17, %v3923_v2  ;;  %v1937_v21 = vpop.f32.mrb[63].mxu1  ;;  %v2578_v24 = vmul.f32 -1.442695, %v1932_v12 }
 0x4bd   : > { %v2972_v22 = vpop.eup %2971  ;;  %2989 = vrcp.f32 %v2056_v15  ;;  %v2058_v23 = vadd.f32 1.0, %v2970_v18  ;;  %v1938_v25 = vadd.f32 %v1937_v21, %v3926_v58  ;;  %v2579_v35 = vmul.f32 -1.442695, %v1934_v16 }
 0x4be   : > { %2991 = vrcp.f32 %v2057_v19  ;;  %v2059_v26 = vadd.f32 1.0, %v2972_v22  ;;  %v2580_v29 = vmul.f32 -1.442695, %v1936_v20 }
 0x4bf   : > { %v2974_v28 = vpop.eup %2973  ;;  %2993 = vrcp.f32 %v2058_v23  ;;  %v2581_v2 = vmul.f32 -1.442695, %v1938_v25 }
 0x4c0   : > { %v2976_v36 = vpop.eup %2975  ;;  %2148 = vst [vmem:[%s3946_s26 + $0x80] sm:$0xff] %v2974_v28  ;;  %2995 = vrcp.f32 %v2059_v26 }
 0x4c1   : > { %v2978_v30 = vpop.eup %2977  ;;  %2149 = vst [vmem:[%s3946_s26 + $0x88] sm:$0xff] %v2976_v36  ;;  %2997 = vpow2.f32 %v2578_v24 }
 0x4c2   : > { %v2980_v31 = vpop.eup %2979  ;;  %2150 = vst [vmem:[%s3946_s26 + $0x90] sm:$0xff] %v2978_v30  ;;  %2999 = vpow2.f32 %v2579_v35 }
 0x4c3   : > { %v2982_v33 = vpop.eup %2981  ;;  %2151 = vst [vmem:[%s3946_s26 + $0x98] sm:$0xff] %v2980_v31  ;;  %3001 = vpow2.f32 %v2580_v29 }
 0x4c4   : > { %v2984_v58 = vpop.eup %2983  ;;  %v2060_v37 = vadd.f32 1.0, %v2982_v33  ;;  %3003 = vpow2.f32 %v2581_v2 }
 0x4c5   : > { %v2986_v38 = vpop.eup %2985  ;;  %v2061_v39 = vadd.f32 1.0, %v2984_v58 }
 0x4c6   : > { %v2988_v40 = vpop.eup %2987  ;;  %3005 = vrcp.f32 %v2060_v37  ;;  %v2062_v41 = vadd.f32 1.0, %v2986_v38 }
 0x4c7   : > { %v2990_v42 = vpop.eup %2989  ;;  %3007 = vrcp.f32 %v2061_v39  ;;  %v2063_v43 = vadd.f32 1.0, %v2988_v40 }
 0x4c8   : > { %v2992_v44 = vpop.eup %2991  ;;  %2152 = vst [vmem:[%s3946_s26 + $0xa0] sm:$0xff] %v2990_v42  ;;  %3009 = vrcp.f32 %v2062_v41 }
 0x4c9   : > { %v2994_v45 = vpop.eup %2993  ;;  %2153 = vst [vmem:[%s3946_s26 + $0xa8] sm:$0xff] %v2992_v44  ;;  %3011 = vrcp.f32 %v2063_v43 }
 0x4ca   : > { %v2996_v46 = vpop.eup %2995  ;;  %2154 = vst [vmem:[%s3946_s26 + $0xb0] sm:$0xff] %v2994_v45 }
 0x4cb   : > { %v2998_v47 = vpop.eup %2997  ;;  %2155 = vst [vmem:[%s3946_s26 + $0xb8] sm:$0xff] %v2996_v46 }
 0x4cc   : > { %v3000_v48 = vpop.eup %2999  ;;  %v2064_v49 = vadd.f32 1.0, %v2998_v47 }
 0x4cd   : > { %v3002_v50 = vpop.eup %3001  ;;  %v2065_v51 = vadd.f32 1.0, %v3000_v48 }
 0x4ce   : > { %v3004_v52 = vpop.eup %3003  ;;  %3013 = vrcp.f32 %v2064_v49  ;;  %v2066_v53 = vadd.f32 1.0, %v3002_v50 }
 0x4cf   : > { %3015 = vrcp.f32 %v2065_v51  ;;  %v2067_v54 = vadd.f32 1.0, %v3004_v52 }
 0x4d0   : > { %v3006_v55 = vpop.eup %3005  ;;  %3017 = vrcp.f32 %v2066_v53 }
 0x4d1   : > { %v3008_v56 = vpop.eup %3007  ;;  %2156 = vst [vmem:[%s3946_s26 + $0xc0] sm:$0xff] %v3006_v55  ;;  %3019 = vrcp.f32 %v2067_v54 }
 0x4d2   : > { %v3010_v57 = vpop.eup %3009  ;;  %2157 = vst [vmem:[%s3946_s26 + $0xc8] sm:$0xff] %v3008_v56 }
 0x4d3   : > { %v3012_v27 = vpop.eup %3011  ;;  %2158 = vst [vmem:[%s3946_s26 + $0xd0] sm:$0xff] %v3010_v57 }
 0x4d4   : > { %2159 = vst [vmem:[%s3946_s26 + $0xd8] sm:$0xff] %v3012_v27 }
 0x4d8   : > { %v3014_v61 = vpop.eup %3013 }
 0x4d9   : > { %v3016_v62 = vpop.eup %3015  ;;  %2160 = vst [vmem:[%s3946_s26 + $0xe0] sm:$0xff] %v3014_v61 }
 0x4da   : > { %v3018_v63 = vpop.eup %3017  ;;  %2161 = vst [vmem:[%s3946_s26 + $0xe8] sm:$0xff] %v3016_v62 }
 0x4db   : > { %v3020_v0 = vpop.eup %3019  ;;  %2162 = vst [vmem:[%s3946_s26 + $0xf0] sm:$0xff] %v3018_v63 }
 0x4dc   : > { %2163 = vst [vmem:[%s3946_s26 + $0xf8] sm:$0xff] %v3020_v0 }
 0x4dd   : > { %3234 = shalt.err (!%p3231_p12)
}
 0x4de   : > { %s3235_s27 = scalar_lea.hbm %s4000_s13, 4096  ;;  %s3239_s12 = scalar_lea.hbm %s4105_s14, 8192 }
 0x4df   : > { %p3236_p1 = scmp.ne.s32.totalorder %s4000_s13, %s3235_s27  ;;  %p3240_p0 = scmp.lt.u32.totalorder %s4000_s13, %s4105_s14 }
 0x4e0   : > { %p3241_p4 = scmp.lt.u32.totalorder %s3239_s12, %s3235_s27  ;;  %p3243_p3 = scmp.lt.u32.totalorder %s3235_s27, %s4000_s13 }
 0x4e1   : > { %p3237_p2 = pnand %p3236_p1, %p3553_p10 }
 0x4e2   : > { %p3242_p6 = por %p3241_p4, %p3240_p0 }
 0x4e3   : > { %p3238_p13 = pneg %p3237_p2 }
 0x4e4   : > { %p3244_p5 = por %p3243_p3, %p3242_p6 }
 0x4e6   : > { %p3245_p9 = pnand %p3244_p5, %p3238_p13 }
 0x4e8   : > { %3248 = shalt.err (!%p3245_p9)
}
 0x4e9   : > { %2619 = dma.vmem_to_hbm [thread:$0]  (%p3553_p10), %s4002_s10, 4096, %s4000_s13, %s2197_s4, %s3319_s0, %s3319_s0, %s3320_s25  }
 0x4ea PF: > { %s4106_s15 = sld [smem:[#allocation23_spill]]  ;;  %s4107_s29 = sld [smem:[#allocation24_spill]] }
 0x4eb   : > { %p4109_p11 = scmp.ge.s32.totalorder %s3307_s20, 2 }
 0x4f0   : > { %s2248_s21 = sand.u32 1, %s4106_s15   ;;  %p4108_p8 = scmp.ne.s32.totalorder %s4107_s29, 0 }
 0x4f1   : > { %s2249_s16 = scalar_lea.sflag [#allocation4], %s2248_s21 }
 0x4f2   : > { %p2644_p7 = pnand %p4109_p11, %p4108_p8 }
 0x4f4   : > { %3286 = dma.done.wait (!%p2644_p7), %s2249_s16, 4096  }
 0x4f5   : > { %3288 = vsyncadd (!%p2644_p7), %s2249_s16, 4294963200  ;;  %s2258_s17 = scalar_lea.sflag [#allocation15], %s2248_s21 }
 0x4f6   : > { %3290 = dma.done.wait (!%p2644_p7), %s2258_s17, 4096  }
 0x4f7   : > { %3292 = vsyncadd (!%p2644_p7), %s2258_s17, 4294963200  ;;  %p33_p10 = scmp.ge.s32.totalorder %s3543_s24, 4   ;;  %s4110_s17 = smov %s3299_s18 }
 0x4f8   : > { %s4111_s18 = smov %s3303_s19  ;;  %s4112_s19 = smov %s3559_s22 }
 0x4f9   : > { %s4113_s20 = smov %s3543_s24  ;;  %35 = sbr.rel (!%p33_p10) target bundleno = 18 (0x12), region = 151 }
 0x500   :  { %2263 = vsyncpa [#allocation3], 1 }
 0x501   :  { %2265 = vsyncpa [#allocation3 + $0x1], 1 }
 0x502   :  { %2266 = vsyncpa [#allocation6], 1 }
 0x503   :  { %2268 = vsyncpa [#allocation6 + $0x1], 1 }
 0x504   :  { %2269 = vsyncpa [#allocation9], 1 }
 0x505   :  { %2270 = vsyncpa [#allocation12], 1 }
 0x506   :  { %2271 = vsyncpa [#allocation4], 1 }
 0x507   :  { %2273 = vsyncpa [#allocation4 + $0x1], 1 }
 0x508   :  { %2274 = vsyncpa [#allocation15], 1 }
 0x509   :  { %2276 = vsyncpa [#allocation15 + $0x1], 1 }

</bundles_post_ra>
